<compile_context>
chip_gen: v7x
topology: tpu7x:2x2x1
jax: 0.10.0
libtpu: 0.0.40
codegen_flags: <defaults>
</compile_context>

<pallas_src>
import functools
import math

import jax
import jax.numpy as jnp
from jax import lax
from jax.experimental import pallas as pl
from jax.experimental.pallas import tpu as pltpu


# --------------------------- model config ---------------------------

CFG = dict(vocab=32, d_model=128, n_layers=2, n_heads=4, d_kv=32, d_ff=256,
           rel_buckets=8, rel_max_dist=16, out_dim=128)
# project_in_dim == d_model; out_dim shrunk from 4096 -> 128 for the small demo.

NEG_INF = -1e9        # finite masked-logit value (avoids -inf -> NaN softmax)
LN_EPS = 1e-6
MAX_BATCH_BLOCK = 4   # cap on batch rows unrolled inside one grid step


def _batch_block(batch):
    """Batch rows per grid step.

    As large as possible (bigger matmul M, fewer fixed per-step costs) while
    keeping >=2 grid steps when batch >= 2 so a 'parallel' grid axis can be
    sharded across both v7x TensorCores, and keeping the in-kernel unroll
    bounded.  Always a divisor of `batch`, so no padding is needed.
    """
    target = min(max(1, batch // 2), MAX_BATCH_BLOCK)
    for bb in range(target, 0, -1):
        if batch % bb == 0:
            return bb
    return 1


# --------------------------- fused encoder-layer kernel ---------------------------

def _make_layer_kernel(bb, n_heads):
    """One full T5 encoder layer for `bb` batch rows per grid step."""

    def kernel(x_ref, bias_ref, mask_ref,
               g1_ref, wq_ref, wk_ref, wv_ref, wo_ref,
               g2_ref, wi_ref, wo2_ref, o_ref):
        bias = bias_ref[...]                                    # (H, S, S) f32, shared
        for b in range(bb):                                     # static unroll
            x = x_ref[b].astype(jnp.float32)                    # (S, D)

            # ---- T5LayerNorm (no mean subtraction, no bias) for attention ----
            var = jnp.mean(x * x, axis=-1, keepdims=True)
            xn = ((x * lax.rsqrt(var + LN_EPS)) * g1_ref[...]).astype(jnp.bfloat16)

            # bias + additive mask combined ONCE per row (not per head).
            bm = bias + mask_ref[b]                             # (H, S, S)

            # ---- multi-head self-attention (per-head weights: leading-dim
            #      indexing only -> no unaligned lane slices, no concats) ----
            proj = None
            for h in range(n_heads):                            # static unroll
                q = jnp.dot(xn, wq_ref[h], preferred_element_type=jnp.float32)
                k = jnp.dot(xn, wk_ref[h], preferred_element_type=jnp.float32)
                v = jnp.dot(xn, wv_ref[h], preferred_element_type=jnp.float32)
                # T5 does NOT scale QK^T by 1/sqrt(d_kv).  Contract over the
                # shared last dim -- no k.T materialization.
                s = lax.dot_general(q, k, (((1,), (1,)), ((), ())),
                                    preferred_element_type=jnp.float32)
                s = s + bm[h]                                   # (S, S)
                m = jnp.max(s, axis=-1, keepdims=True)
                e = jnp.exp(s - m)
                # NEG_INF is finite, so fully-masked rows still give a finite,
                # nonzero denominator (uniform attention) -- no NaN.
                p = e * pl.reciprocal(jnp.sum(e, axis=-1, keepdims=True),
                                      approx=True)
                ctx = jnp.dot(p, v, preferred_element_type=jnp.float32)   # (S, Dh)
                contrib = jnp.dot(ctx.astype(jnp.bfloat16), wo_ref[h],
                                  preferred_element_type=jnp.float32)     # (S, D)
                proj = contrib if proj is None else proj + contrib
            x1 = x + proj                                       # attn residual (f32)

            # ---- FFN sublayer: T5LayerNorm + wi -> ReLU -> Dropout(eval) -> wo_ff ----
            var2 = jnp.mean(x1 * x1, axis=-1, keepdims=True)
            xn2 = ((x1 * lax.rsqrt(var2 + LN_EPS)) * g2_ref[...]).astype(jnp.bfloat16)
            hdn = jnp.dot(xn2, wi_ref[...], preferred_element_type=jnp.float32)
            hdn = jnp.maximum(hdn, 0.0)
            # TODO(synk): training-mode dropout via pltpu.prng_seed / prng_random_bits.
            y = jnp.dot(hdn.astype(jnp.bfloat16), wo2_ref[...],
                        preferred_element_type=jnp.float32)
            o_ref[b] = (x1 + y).astype(o_ref.dtype)             # ffn residual, bf16 out

    return kernel


def encoder_layer(x, pos_bias, mask_add, lp, cfg):
    """x: (B, S, D) bf16 residual stream -> (B, S, D) bf16."""
    B, S, D = x.shape
    H, Dh, F = cfg['n_heads'], cfg['d_kv'], cfg['d_ff']
    inner = H * Dh
    bb = _batch_block(B)

    flops = int(2 * B * S * (3 * D * inner + inner * D + 2 * D * F)
                + 4 * B * H * S * S * Dh)
    trans = int(B * H * S * S + 2 * B * S)
    bytes_acc = int(2 * 2 * B * S * D                 # bf16 residual in + out
                    + 4 * H * S * S + 4 * B * S       # shared bias + mask
                    + 8 * D                           # LN weights
                    + 2 * (4 * H * D * Dh + 2 * D * F))  # bf16 weights

    return pl.pallas_call(
        _make_layer_kernel(bb, H),
        out_shape=jax.ShapeDtypeStruct((B, S, D), jnp.bfloat16),
        grid=(B // bb,),
        in_specs=[
            pl.BlockSpec((bb, S, D), lambda i: (i, 0, 0)),   # residual stream (bf16)
            pl.BlockSpec((H, S, S), lambda i: (0, 0, 0)),    # shared rel-pos bias
            pl.BlockSpec((bb, 1, S), lambda i: (i, 0, 0)),   # additive mask
            pl.BlockSpec((1, D), lambda i: (0, 0)),          # attn LN weight
            pl.BlockSpec((H, D, Dh), lambda i: (0, 0, 0)),   # wq (head-major)
            pl.BlockSpec((H, D, Dh), lambda i: (0, 0, 0)),   # wk
            pl.BlockSpec((H, D, Dh), lambda i: (0, 0, 0)),   # wv
            pl.BlockSpec((H, Dh, D), lambda i: (0, 0, 0)),   # wo (head-major)
            pl.BlockSpec((1, D), lambda i: (0, 0)),          # ffn LN weight
            pl.BlockSpec((D, F), lambda i: (0, 0)),          # wi
            pl.BlockSpec((F, D), lambda i: (0, 0)),          # wo_ff
        ],
        out_specs=pl.BlockSpec((bb, S, D), lambda i: (i, 0, 0)),
        compiler_params=pltpu.CompilerParams(dimension_semantics=("parallel",)),
        cost_estimate=pl.CostEstimate(flops=flops, transcendentals=trans,
                                      bytes_accessed=bytes_acc),
    )(x, pos_bias, mask_add,
      lp['attn_ln'].reshape(1, D), lp['wq'], lp['wk'], lp['wv'], lp['wo'],
      lp['ffn_ln'].reshape(1, D), lp['wi'], lp['wo_ff'])


# --------------------------- final LN + projection head ---------------------------

def _make_head_kernel(bb):
    def kernel(x_ref, g_ref, w1_ref, w2_ref, o_ref):
        for b in range(bb):                                     # static unroll
            x = x_ref[b].astype(jnp.float32)                    # (S, D)
            var = jnp.mean(x * x, axis=-1, keepdims=True)
            xn = ((x * lax.rsqrt(var + LN_EPS)) * g_ref[...]).astype(jnp.bfloat16)
            h = jnp.dot(xn, w1_ref[...], preferred_element_type=jnp.float32)
            h = jnp.maximum(h, 0.0)
            # Dropout(0.1) is an eval-mode identity.
            y = jnp.dot(h.astype(jnp.bfloat16), w2_ref[...],
                        preferred_element_type=jnp.float32)
            o_ref[b] = y.astype(o_ref.dtype)
    return kernel


def final_head(x, final_ln, w1, w2, out_dim):
    """Final T5LayerNorm + (Linear -> ReLU -> Dropout(eval) -> Linear)."""
    B, S, D = x.shape
    N1 = w1.shape[1]
    bb = _batch_block(B)
    flops = int(2 * B * S * (D * N1 + N1 * out_dim))
    bytes_acc = int(2 * B * S * D + 4 * B * S * out_dim + 4 * D
                    + 2 * (D * N1 + N1 * out_dim))
    return pl.pallas_call(
        _make_head_kernel(bb),
        out_shape=jax.ShapeDtypeStruct((B, S, out_dim), jnp.float32),
        grid=(B // bb,),
        in_specs=[
            pl.BlockSpec((bb, S, D), lambda i: (i, 0, 0)),
            pl.BlockSpec((1, D), lambda i: (0, 0)),
            pl.BlockSpec((D, N1), lambda i: (0, 0)),
            pl.BlockSpec((N1, out_dim), lambda i: (0, 0)),
        ],
        out_specs=pl.BlockSpec((bb, S, out_dim), lambda i: (i, 0, 0)),
        compiler_params=pltpu.CompilerParams(dimension_semantics=("parallel",)),
        cost_estimate=pl.CostEstimate(flops=flops, transcendentals=int(2 * B * S),
                                      bytes_accessed=bytes_acc),
    )(x, final_ln.reshape(1, D), w1, w2)


# --------------------------- params & glue (plain JAX) ---------------------------

def init_params(key, cfg):
    D, H, Dh = cfg['d_model'], cfg['n_heads'], cfg['d_kv']
    keys = iter(jax.random.split(key, 64))

    def w(shape, dtype=jnp.bfloat16, scale=0.02):
        return (scale * jax.random.normal(next(keys), shape, jnp.float32)).astype(dtype)

    params = dict(
        embed=w((cfg['vocab'], D), jnp.float32, 1.0),
        rel_bias=w((cfg['rel_buckets'], H), jnp.float32, 0.5),
        final_ln=jnp.ones((D,), jnp.float32),
        # final_projection: Linear(project_in_dim,out_dim,bias=False) -> ReLU
        #                   -> Dropout(0.1) -> Linear(out_dim,out_dim,bias=False)
        proj_w1=w((D, cfg['out_dim'])),
        proj_w2=w((cfg['out_dim'], cfg['out_dim'])),
        layers=[],
    )
    for _ in range(cfg['n_layers']):
        params['layers'].append(dict(
            attn_ln=jnp.ones((D,), jnp.float32),
            wq=w((H, D, Dh)),       # head-major attention weights
            wk=w((H, D, Dh)),
            wv=w((H, D, Dh)),
            wo=w((H, Dh, D)),
            ffn_ln=jnp.ones((D,), jnp.float32),
            wi=w((D, cfg['d_ff'])),
            wo_ff=w((cfg['d_ff'], D)),
        ))
    return params


def _relative_position_bucket(rel_pos, num_buckets, max_distance):
    # Bidirectional (encoder) bucketing, matches HF T5.
    num_buckets = num_buckets // 2
    buckets = (rel_pos > 0).astype(jnp.int32) * num_buckets
    rel_pos = jnp.abs(rel_pos)
    max_exact = num_buckets // 2
    is_small = rel_pos < max_exact
    rel_f = jnp.maximum(rel_pos, 1).astype(jnp.float32)
    large = max_exact + (jnp.log(rel_f / max_exact)
                         / math.log(max_distance / max_exact)
                         * (num_buckets - max_exact)).astype(jnp.int32)
    large = jnp.minimum(large, num_buckets - 1)
    return buckets + jnp.where(is_small, rel_pos, large)


def compute_position_bias(rel_bias_weight, S, cfg):
    ctx = jnp.arange(S, dtype=jnp.int32)[:, None]
    mem = jnp.arange(S, dtype=jnp.int32)[None, :]
    buckets = _relative_position_bucket(mem - ctx, cfg['rel_buckets'],
                                        cfg['rel_max_dist'])     # (S, S)
    vals = rel_bias_weight[buckets]                               # (S, S, H)
    return jnp.transpose(vals, (2, 0, 1)).astype(jnp.float32)     # (H, S, S)


def t5_encoder_with_projection(params, input_ids, attention_mask, cfg):
    B, S = input_ids.shape
    D = cfg['d_model']

    # Embedding gather in plain JAX; residual stream carried in bf16.
    x = params['embed'][input_ids].astype(jnp.bfloat16)               # (B, S, D)
    # Additive attention mask, per batch row (never expanded to (B*H,S,S)).
    mask_add = ((1.0 - attention_mask.astype(jnp.float32)) * NEG_INF).reshape(B, 1, S)
    # Relative-position bias computed once, shared by every layer (T5 semantics).
    pos_bias = compute_position_bias(params['rel_bias'], S, cfg)      # (H, S, S)

    for lp in params['layers']:
        x = encoder_layer(x, pos_bias, mask_add, lp, cfg)             # one kernel/layer

    return final_head(x, params['final_ln'], params['proj_w1'], params['proj_w2'],
                      cfg['out_dim'])                                 # (B, S, out_dim) f32


# ---------------------------------- main ----------------------------------

if __name__ == "__main__":
    key = jax.random.PRNGKey(0)
    pkey, ikey = jax.random.split(key)
    params = init_params(pkey, CFG)

    B, S = 2, 8
    input_ids = jax.random.randint(ikey, (B, S), 0, CFG['vocab'], dtype=jnp.int32)
    attention_mask = jnp.ones((B, S), jnp.float32)

    fwd = jax.jit(functools.partial(t5_encoder_with_projection, cfg=CFG))
    out = jax.block_until_ready(fwd(params, input_ids, attention_mask))
    assert out.shape == (B, S, CFG['out_dim'])
    assert bool(jnp.all(jnp.isfinite(out)))
    print("KERNEL_OK")
</pallas_src>

<mosaic_0001>
module attributes {stable_mosaic.version = 11 : i64} {
  func.func @kernel(%arg0: i32, %arg1: memref<1x8x128xbf16, #tpu.memory_space<vmem>>, %arg2: memref<1x128xf32, #tpu.memory_space<vmem>>, %arg3: memref<128x128xbf16, #tpu.memory_space<vmem>>, %arg4: memref<128x128xbf16, #tpu.memory_space<vmem>>, %arg5: memref<1x8x128xf32, #tpu.memory_space<vmem>>) attributes {dimension_semantics = [#tpu.dimension_semantics<parallel>], iteration_bounds = array<i64: 2>, scalar_prefetch = 0 : i64, scratch_operands = 0 : i64, tpu.core_type = #tpu.core_type<tc>, window_params = [{transform_indices = @transform_0, window_bounds = array<i64: 1, 8, 128>}, {pipeline_mode = #tpu.pipeline_mode<synchronous>, transform_indices = @transform_1, window_bounds = array<i64: 1, 128>}, {pipeline_mode = #tpu.pipeline_mode<synchronous>, transform_indices = @transform_2, window_bounds = array<i64: 128, 128>}, {pipeline_mode = #tpu.pipeline_mode<synchronous>, transform_indices = @transform_3, window_bounds = array<i64: 128, 128>}, {transform_indices = @transform_4, window_bounds = array<i64: 1, 8, 128>}]} {
    %c0 = arith.constant 0 : index
    %c0_0 = arith.constant 0 : index
    %c0_1 = arith.constant 0 : index
    %0 = vector.load %arg1[%c0, %c0_0, %c0_1] : memref<1x8x128xbf16, #tpu.memory_space<vmem>>, vector<1x8x128xbf16>
    %1 = vector.shape_cast %0 : vector<1x8x128xbf16> to vector<8x128xbf16>
    %2 = arith.extf %1 : vector<8x128xbf16> to vector<8x128xf32>
    %3 = arith.mulf %2, %2 : vector<8x128xf32>
    %cst = arith.constant dense<0.000000e+00> : vector<8xf32>
    %4 = vector.multi_reduction <add>, %3, %cst [1] : vector<8x128xf32> to vector<8xf32>
    %5 = vector.shape_cast %4 : vector<8xf32> to vector<8x1xf32>
    %cst_2 = arith.constant 1.280000e+02 : f32
    %6 = vector.broadcast %cst_2 : f32 to vector<8x1xf32>
    %7 = arith.divf %5, %6 : vector<8x1xf32>
    %cst_3 = arith.constant 9.99999997E-7 : f32
    %8 = vector.broadcast %cst_3 : f32 to vector<8x1xf32>
    %9 = arith.addf %7, %8 : vector<8x1xf32>
    %10 = math.rsqrt %9 : vector<8x1xf32>
    %11 = vector.broadcast %10 : vector<8x1xf32> to vector<8x128xf32>
    %12 = arith.mulf %2, %11 : vector<8x128xf32>
    %c0_4 = arith.constant 0 : index
    %c0_5 = arith.constant 0 : index
    %13 = vector.load %arg2[%c0_4, %c0_5] : memref<1x128xf32, #tpu.memory_space<vmem>>, vector<1x128xf32>
    %14 = vector.broadcast %13 : vector<1x128xf32> to vector<8x128xf32>
    %15 = arith.mulf %12, %14 : vector<8x128xf32>
    %16 = arith.truncf %15 : vector<8x128xf32> to vector<8x128xbf16>
    %c0_6 = arith.constant 0 : index
    %c0_7 = arith.constant 0 : index
    %17 = vector.load %arg3[%c0_6, %c0_7] : memref<128x128xbf16, #tpu.memory_space<vmem>>, vector<128x128xbf16>
    %cst_8 = arith.constant dense<0.000000e+00> : vector<8x128xf32>
    %18 = tpu.matmul %16, %17, %cst_8 {dimension_numbers = #tpu.dot_dimension_numbers<[1], [0], [0], [1], [0, 0, 1, 1], [], []>} : vector<8x128xbf16>, vector<128x128xbf16>, vector<8x128xf32> -> vector<8x128xf32>
    %cst_9 = arith.constant 0.000000e+00 : f32
    %19 = vector.broadcast %cst_9 : f32 to vector<8x128xf32>
    %20 = arith.maximumf %18, %19 : vector<8x128xf32>
    %21 = arith.truncf %20 : vector<8x128xf32> to vector<8x128xbf16>
    %c0_10 = arith.constant 0 : index
    %c0_11 = arith.constant 0 : index
    %22 = vector.load %arg4[%c0_10, %c0_11] : memref<128x128xbf16, #tpu.memory_space<vmem>>, vector<128x128xbf16>
    %cst_12 = arith.constant dense<0.000000e+00> : vector<8x128xf32>
    %23 = tpu.matmul %21, %22, %cst_12 {dimension_numbers = #tpu.dot_dimension_numbers<[1], [0], [0], [1], [0, 0, 1, 1], [], []>} : vector<8x128xbf16>, vector<128x128xbf16>, vector<8x128xf32> -> vector<8x128xf32>
    %c0_13 = arith.constant 0 : index
    %c0_14 = arith.constant 0 : index
    %c0_15 = arith.constant 0 : index
    %24 = vector.load %arg5[%c0_13, %c0_14, %c0_15] : memref<1x8x128xf32, #tpu.memory_space<vmem>>, vector<1x8x128xf32>
    %25 = vector.shape_cast %24 : vector<1x8x128xf32> to vector<8x128xf32>
    %26 = vector.shape_cast %23 : vector<8x128xf32> to vector<1x8x128xf32>
    tpu.vector_store %arg5[%c0_13, %c0_14, %c0_15], %26 {strides = array<i32>} : memref<1x8x128xf32, #tpu.memory_space<vmem>>, vector<1x8x128xf32>,
    return
  }
  func.func @transform_0(%arg0: i32) -> (i32, i32, i32) {
    %c0_i32 = arith.constant 0 : i32
    %c0_i32_0 = arith.constant 0 : i32
    %c0_i32_1 = arith.constant 0 : i32
    return %arg0, %c0_i32, %c0_i32_0 : i32, i32, i32
  }
  func.func @transform_1(%arg0: i32) -> (i32, i32) {
    %c0_i32 = arith.constant 0 : i32
    %c0_i32_0 = arith.constant 0 : i32
    %c0_i32_1 = arith.constant 0 : i32
    return %c0_i32, %c0_i32_0 : i32, i32
  }
  func.func @transform_2(%arg0: i32) -> (i32, i32) {
    %c0_i32 = arith.constant 0 : i32
    %c0_i32_0 = arith.constant 0 : i32
    %c0_i32_1 = arith.constant 0 : i32
    return %c0_i32, %c0_i32_0 : i32, i32
  }
  func.func @transform_3(%arg0: i32) -> (i32, i32) {
    %c0_i32 = arith.constant 0 : i32
    %c0_i32_0 = arith.constant 0 : i32
    %c0_i32_1 = arith.constant 0 : i32
    return %c0_i32, %c0_i32_0 : i32, i32
  }
  func.func @transform_4(%arg0: i32) -> (i32, i32, i32) {
    %c0_i32 = arith.constant 0 : i32
    %c0_i32_0 = arith.constant 0 : i32
    %c0_i32_1 = arith.constant 0 : i32
    return %arg0, %c0_i32, %c0_i32_0 : i32, i32, i32
  }
}

module attributes {stable_mosaic.version = 11 : i64} {
  func.func @kernel(%arg0: i32, %arg1: memref<1x8x128xbf16, #tpu.memory_space<vmem>>, %arg2: memref<4x8x8xf32, #tpu.memory_space<vmem>>, %arg3: memref<1x1x8xf32, #tpu.memory_space<vmem>>, %arg4: memref<1x128xf32, #tpu.memory_space<vmem>>, %arg5: memref<4x128x32xbf16, #tpu.memory_space<vmem>>, %arg6: memref<4x128x32xbf16, #tpu.memory_space<vmem>>, %arg7: memref<4x128x32xbf16, #tpu.memory_space<vmem>>, %arg8: memref<4x32x128xbf16, #tpu.memory_space<vmem>>, %arg9: memref<1x128xf32, #tpu.memory_space<vmem>>, %arg10: memref<128x256xbf16, #tpu.memory_space<vmem>>, %arg11: memref<256x128xbf16, #tpu.memory_space<vmem>>, %arg12: memref<1x8x128xbf16, #tpu.memory_space<vmem>>) attributes {dimension_semantics = [#tpu.dimension_semantics<parallel>], iteration_bounds = array<i64: 2>, scalar_prefetch = 0 : i64, scratch_operands = 0 : i64, tpu.core_type = #tpu.core_type<tc>, window_params = [{transform_indices = @transform_0, window_bounds = array<i64: 1, 8, 128>}, {pipeline_mode = #tpu.pipeline_mode<synchronous>, transform_indices = @transform_1, window_bounds = array<i64: 4, 8, 8>}, {transform_indices = @transform_2, window_bounds = array<i64: 1, 1, 8>}, {pipeline_mode = #tpu.pipeline_mode<synchronous>, transform_indices = @transform_3, window_bounds = array<i64: 1, 128>}, {pipeline_mode = #tpu.pipeline_mode<synchronous>, transform_indices = @transform_4, window_bounds = array<i64: 4, 128, 32>}, {pipeline_mode = #tpu.pipeline_mode<synchronous>, transform_indices = @transform_5, window_bounds = array<i64: 4, 128, 32>}, {pipeline_mode = #tpu.pipeline_mode<synchronous>, transform_indices = @transform_6, window_bounds = array<i64: 4, 128, 32>}, {pipeline_mode = #tpu.pipeline_mode<synchronous>, transform_indices = @transform_7, window_bounds = array<i64: 4, 32, 128>}, {pipeline_mode = #tpu.pipeline_mode<synchronous>, transform_indices = @transform_8, window_bounds = array<i64: 1, 128>}, {pipeline_mode = #tpu.pipeline_mode<synchronous>, transform_indices = @transform_9, window_bounds = array<i64: 128, 256>}, {pipeline_mode = #tpu.pipeline_mode<synchronous>, transform_indices = @transform_10, window_bounds = array<i64: 256, 128>}, {transform_indices = @transform_11, window_bounds = array<i64: 1, 8, 128>}]} {
    %c0 = arith.constant 0 : index
    %c0_0 = arith.constant 0 : index
    %c0_1 = arith.constant 0 : index
    %0 = vector.load %arg2[%c0, %c0_0, %c0_1] : memref<4x8x8xf32, #tpu.memory_space<vmem>>, vector<4x8x8xf32>
    %c0_2 = arith.constant 0 : index
    %c0_3 = arith.constant 0 : index
    %c0_4 = arith.constant 0 : index
    %1 = vector.load %arg1[%c0_2, %c0_3, %c0_4] : memref<1x8x128xbf16, #tpu.memory_space<vmem>>, vector<1x8x128xbf16>
    %2 = vector.shape_cast %1 : vector<1x8x128xbf16> to vector<8x128xbf16>
    %3 = arith.extf %2 : vector<8x128xbf16> to vector<8x128xf32>
    %4 = arith.mulf %3, %3 : vector<8x128xf32>
    %cst = arith.constant dense<0.000000e+00> : vector<8xf32>
    %5 = vector.multi_reduction <add>, %4, %cst [1] : vector<8x128xf32> to vector<8xf32>
    %6 = vector.shape_cast %5 : vector<8xf32> to vector<8x1xf32>
    %cst_5 = arith.constant 1.280000e+02 : f32
    %7 = vector.broadcast %cst_5 : f32 to vector<8x1xf32>
    %8 = arith.divf %6, %7 : vector<8x1xf32>
    %cst_6 = arith.constant 9.99999997E-7 : f32
    %9 = vector.broadcast %cst_6 : f32 to vector<8x1xf32>
    %10 = arith.addf %8, %9 : vector<8x1xf32>
    %11 = math.rsqrt %10 : vector<8x1xf32>
    %12 = vector.broadcast %11 : vector<8x1xf32> to vector<8x128xf32>
    %13 = arith.mulf %3, %12 : vector<8x128xf32>
    %c0_7 = arith.constant 0 : index
    %c0_8 = arith.constant 0 : index
    %14 = vector.load %arg4[%c0_7, %c0_8] : memref<1x128xf32, #tpu.memory_space<vmem>>, vector<1x128xf32>
    %15 = vector.broadcast %14 : vector<1x128xf32> to vector<8x128xf32>
    %16 = arith.mulf %13, %15 : vector<8x128xf32>
    %17 = arith.truncf %16 : vector<8x128xf32> to vector<8x128xbf16>
    %c0_9 = arith.constant 0 : index
    %c0_10 = arith.constant 0 : index
    %c0_11 = arith.constant 0 : index
    %18 = vector.load %arg3[%c0_9, %c0_10, %c0_11] : memref<1x1x8xf32, #tpu.memory_space<vmem>>, vector<1x1x8xf32>
    %19 = vector.shape_cast %18 : vector<1x1x8xf32> to vector<1x8xf32>
    %20 = vector.shape_cast %19 : vector<1x8xf32> to vector<1x1x8xf32>
    %21 = vector.broadcast %20 : vector<1x1x8xf32> to vector<4x8x8xf32>
    %22 = arith.addf %0, %21 : vector<4x8x8xf32>
    %c0_12 = arith.constant 0 : index
    %c0_13 = arith.constant 0 : index
    %c0_14 = arith.constant 0 : index
    %23 = vector.load %arg5[%c0_12, %c0_13, %c0_14] : memref<4x128x32xbf16, #tpu.memory_space<vmem>>, vector<1x128x32xbf16>
    %24 = vector.shape_cast %23 : vector<1x128x32xbf16> to vector<128x32xbf16>
    %cst_15 = arith.constant dense<0.000000e+00> : vector<8x32xf32>
    %25 = tpu.matmul %17, %24, %cst_15 {dimension_numbers = #tpu.dot_dimension_numbers<[1], [0], [0], [1], [0, 0, 1, 1], [], []>} : vector<8x128xbf16>, vector<128x32xbf16>, vector<8x32xf32> -> vector<8x32xf32>
    %c0_16 = arith.constant 0 : index
    %c0_17 = arith.constant 0 : index
    %c0_18 = arith.constant 0 : index
    %26 = vector.load %arg6[%c0_16, %c0_17, %c0_18] : memref<4x128x32xbf16, #tpu.memory_space<vmem>>, vector<1x128x32xbf16>
    %27 = vector.shape_cast %26 : vector<1x128x32xbf16> to vector<128x32xbf16>
    %cst_19 = arith.constant dense<0.000000e+00> : vector<8x32xf32>
    %28 = tpu.matmul %17, %27, %cst_19 {dimension_numbers = #tpu.dot_dimension_numbers<[1], [0], [0], [1], [0, 0, 1, 1], [], []>} : vector<8x128xbf16>, vector<128x32xbf16>, vector<8x32xf32> -> vector<8x32xf32>
    %c0_20 = arith.constant 0 : index
    %c0_21 = arith.constant 0 : index
    %c0_22 = arith.constant 0 : index
    %29 = vector.load %arg7[%c0_20, %c0_21, %c0_22] : memref<4x128x32xbf16, #tpu.memory_space<vmem>>, vector<1x128x32xbf16>
    %30 = vector.shape_cast %29 : vector<1x128x32xbf16> to vector<128x32xbf16>
    %cst_23 = arith.constant dense<0.000000e+00> : vector<8x32xf32>
    %31 = tpu.matmul %17, %30, %cst_23 {dimension_numbers = #tpu.dot_dimension_numbers<[1], [0], [0], [1], [0, 0, 1, 1], [], []>} : vector<8x128xbf16>, vector<128x32xbf16>, vector<8x32xf32> -> vector<8x32xf32>
    %cst_24 = arith.constant dense<0.000000e+00> : vector<8x8xf32>
    %32 = tpu.matmul %25, %28, %cst_24 {dimension_numbers = #tpu.dot_dimension_numbers<[1], [1], [0], [0], [0, 0, 1, 0], [], []>} : vector<8x32xf32>, vector<8x32xf32>, vector<8x8xf32> -> vector<8x8xf32>
    %33 = vector.extract_strided_slice %22 {offsets = [0, 0, 0], sizes = [1, 8, 8], strides = [1, 1, 1]} : vector<4x8x8xf32> to vector<1x8x8xf32>
    %34 = vector.shape_cast %33 : vector<1x8x8xf32> to vector<8x8xf32>
    %35 = arith.addf %32, %34 : vector<8x8xf32>
    %cst_25 = arith.constant dense<0xFF800000> : vector<8xf32>
    %36 = vector.multi_reduction <maximumf>, %35, %cst_25 [1] : vector<8x8xf32> to vector<8xf32>
    %37 = vector.shape_cast %36 : vector<8xf32> to vector<8x1xf32>
    %38 = vector.broadcast %37 : vector<8x1xf32> to vector<8x8xf32>
    %39 = arith.subf %35, %38 : vector<8x8xf32>
    %40 = math.exp %39 : vector<8x8xf32>
    %cst_26 = arith.constant dense<0.000000e+00> : vector<8xf32>
    %41 = vector.multi_reduction <add>, %40, %cst_26 [1] : vector<8x8xf32> to vector<8xf32>
    %42 = vector.shape_cast %41 : vector<8xf32> to vector<8x1xf32>
    %43 = tpu.reciprocal %42 {approx = true} : vector<8x1xf32> -> vector<8x1xf32>
    %44 = vector.broadcast %43 : vector<8x1xf32> to vector<8x8xf32>
    %45 = arith.mulf %40, %44 : vector<8x8xf32>
    %cst_27 = arith.constant dense<0.000000e+00> : vector<8x32xf32>
    %46 = tpu.matmul %45, %31, %cst_27 {dimension_numbers = #tpu.dot_dimension_numbers<[1], [0], [0], [1], [0, 0, 1, 1], [], []>} : vector<8x8xf32>, vector<8x32xf32>, vector<8x32xf32> -> vector<8x32xf32>
    %47 = arith.truncf %46 : vector<8x32xf32> to vector<8x32xbf16>
    %c0_28 = arith.constant 0 : index
    %c0_29 = arith.constant 0 : index
    %c0_30 = arith.constant 0 : index
    %48 = vector.load %arg8[%c0_28, %c0_29, %c0_30] : memref<4x32x128xbf16, #tpu.memory_space<vmem>>, vector<1x32x128xbf16>
    %49 = vector.shape_cast %48 : vector<1x32x128xbf16> to vector<32x128xbf16>
    %cst_31 = arith.constant dense<0.000000e+00> : vector<8x128xf32>
    %50 = tpu.matmul %47, %49, %cst_31 {dimension_numbers = #tpu.dot_dimension_numbers<[1], [0], [0], [1], [0, 0, 1, 1], [], []>} : vector<8x32xbf16>, vector<32x128xbf16>, vector<8x128xf32> -> vector<8x128xf32>
    %c1 = arith.constant 1 : index
    %c0_32 = arith.constant 0 : index
    %c0_33 = arith.constant 0 : index
    %51 = vector.load %arg5[%c1, %c0_32, %c0_33] : memref<4x128x32xbf16, #tpu.memory_space<vmem>>, vector<1x128x32xbf16>
    %52 = vector.shape_cast %51 : vector<1x128x32xbf16> to vector<128x32xbf16>
    %cst_34 = arith.constant dense<0.000000e+00> : vector<8x32xf32>
    %53 = tpu.matmul %17, %52, %cst_34 {dimension_numbers = #tpu.dot_dimension_numbers<[1], [0], [0], [1], [0, 0, 1, 1], [], []>} : vector<8x128xbf16>, vector<128x32xbf16>, vector<8x32xf32> -> vector<8x32xf32>
    %c1_35 = arith.constant 1 : index
    %c0_36 = arith.constant 0 : index
    %c0_37 = arith.constant 0 : index
    %54 = vector.load %arg6[%c1_35, %c0_36, %c0_37] : memref<4x128x32xbf16, #tpu.memory_space<vmem>>, vector<1x128x32xbf16>
    %55 = vector.shape_cast %54 : vector<1x128x32xbf16> to vector<128x32xbf16>
    %cst_38 = arith.constant dense<0.000000e+00> : vector<8x32xf32>
    %56 = tpu.matmul %17, %55, %cst_38 {dimension_numbers = #tpu.dot_dimension_numbers<[1], [0], [0], [1], [0, 0, 1, 1], [], []>} : vector<8x128xbf16>, vector<128x32xbf16>, vector<8x32xf32> -> vector<8x32xf32>
    %c1_39 = arith.constant 1 : index
    %c0_40 = arith.constant 0 : index
    %c0_41 = arith.constant 0 : index
    %57 = vector.load %arg7[%c1_39, %c0_40, %c0_41] : memref<4x128x32xbf16, #tpu.memory_space<vmem>>, vector<1x128x32xbf16>
    %58 = vector.shape_cast %57 : vector<1x128x32xbf16> to vector<128x32xbf16>
    %cst_42 = arith.constant dense<0.000000e+00> : vector<8x32xf32>
    %59 = tpu.matmul %17, %58, %cst_42 {dimension_numbers = #tpu.dot_dimension_numbers<[1], [0], [0], [1], [0, 0, 1, 1], [], []>} : vector<8x128xbf16>, vector<128x32xbf16>, vector<8x32xf32> -> vector<8x32xf32>
    %cst_43 = arith.constant dense<0.000000e+00> : vector<8x8xf32>
    %60 = tpu.matmul %53, %56, %cst_43 {dimension_numbers = #tpu.dot_dimension_numbers<[1], [1], [0], [0], [0, 0, 1, 0], [], []>} : vector<8x32xf32>, vector<8x32xf32>, vector<8x8xf32> -> vector<8x8xf32>
    %61 = vector.extract_strided_slice %22 {offsets = [1, 0, 0], sizes = [1, 8, 8], strides = [1, 1, 1]} : vector<4x8x8xf32> to vector<1x8x8xf32>
    %62 = vector.shape_cast %61 : vector<1x8x8xf32> to vector<8x8xf32>
    %63 = arith.addf %60, %62 : vector<8x8xf32>
    %cst_44 = arith.constant dense<0xFF800000> : vector<8xf32>
    %64 = vector.multi_reduction <maximumf>, %63, %cst_44 [1] : vector<8x8xf32> to vector<8xf32>
    %65 = vector.shape_cast %64 : vector<8xf32> to vector<8x1xf32>
    %66 = vector.broadcast %65 : vector<8x1xf32> to vector<8x8xf32>
    %67 = arith.subf %63, %66 : vector<8x8xf32>
    %68 = math.exp %67 : vector<8x8xf32>
    %cst_45 = arith.constant dense<0.000000e+00> : vector<8xf32>
    %69 = vector.multi_reduction <add>, %68, %cst_45 [1] : vector<8x8xf32> to vector<8xf32>
    %70 = vector.shape_cast %69 : vector<8xf32> to vector<8x1xf32>
    %71 = tpu.reciprocal %70 {approx = true} : vector<8x1xf32> -> vector<8x1xf32>
    %72 = vector.broadcast %71 : vector<8x1xf32> to vector<8x8xf32>
    %73 = arith.mulf %68, %72 : vector<8x8xf32>
    %cst_46 = arith.constant dense<0.000000e+00> : vector<8x32xf32>
    %74 = tpu.matmul %73, %59, %cst_46 {dimension_numbers = #tpu.dot_dimension_numbers<[1], [0], [0], [1], [0, 0, 1, 1], [], []>} : vector<8x8xf32>, vector<8x32xf32>, vector<8x32xf32> -> vector<8x32xf32>
    %75 = arith.truncf %74 : vector<8x32xf32> to vector<8x32xbf16>
    %c1_47 = arith.constant 1 : index
    %c0_48 = arith.constant 0 : index
    %c0_49 = arith.constant 0 : index
    %76 = vector.load %arg8[%c1_47, %c0_48, %c0_49] : memref<4x32x128xbf16, #tpu.memory_space<vmem>>, vector<1x32x128xbf16>
    %77 = vector.shape_cast %76 : vector<1x32x128xbf16> to vector<32x128xbf16>
    %cst_50 = arith.constant dense<0.000000e+00> : vector<8x128xf32>
    %78 = tpu.matmul %75, %77, %cst_50 {dimension_numbers = #tpu.dot_dimension_numbers<[1], [0], [0], [1], [0, 0, 1, 1], [], []>} : vector<8x32xbf16>, vector<32x128xbf16>, vector<8x128xf32> -> vector<8x128xf32>
    %79 = arith.addf %50, %78 : vector<8x128xf32>
    %c2 = arith.constant 2 : index
    %c0_51 = arith.constant 0 : index
    %c0_52 = arith.constant 0 : index
    %80 = vector.load %arg5[%c2, %c0_51, %c0_52] : memref<4x128x32xbf16, #tpu.memory_space<vmem>>, vector<1x128x32xbf16>
    %81 = vector.shape_cast %80 : vector<1x128x32xbf16> to vector<128x32xbf16>
    %cst_53 = arith.constant dense<0.000000e+00> : vector<8x32xf32>
    %82 = tpu.matmul %17, %81, %cst_53 {dimension_numbers = #tpu.dot_dimension_numbers<[1], [0], [0], [1], [0, 0, 1, 1], [], []>} : vector<8x128xbf16>, vector<128x32xbf16>, vector<8x32xf32> -> vector<8x32xf32>
    %c2_54 = arith.constant 2 : index
    %c0_55 = arith.constant 0 : index
    %c0_56 = arith.constant 0 : index
    %83 = vector.load %arg6[%c2_54, %c0_55, %c0_56] : memref<4x128x32xbf16, #tpu.memory_space<vmem>>, vector<1x128x32xbf16>
    %84 = vector.shape_cast %83 : vector<1x128x32xbf16> to vector<128x32xbf16>
    %cst_57 = arith.constant dense<0.000000e+00> : vector<8x32xf32>
    %85 = tpu.matmul %17, %84, %cst_57 {dimension_numbers = #tpu.dot_dimension_numbers<[1], [0], [0], [1], [0, 0, 1, 1], [], []>} : vector<8x128xbf16>, vector<128x32xbf16>, vector<8x32xf32> -> vector<8x32xf32>
    %c2_58 = arith.constant 2 : index
    %c0_59 = arith.constant 0 : index
    %c0_60 = arith.constant 0 : index
    %86 = vector.load %arg7[%c2_58, %c0_59, %c0_60] : memref<4x128x32xbf16, #tpu.memory_space<vmem>>, vector<1x128x32xbf16>
    %87 = vector.shape_cast %86 : vector<1x128x32xbf16> to vector<128x32xbf16>
    %cst_61 = arith.constant dense<0.000000e+00> : vector<8x32xf32>
    %88 = tpu.matmul %17, %87, %cst_61 {dimension_numbers = #tpu.dot_dimension_numbers<[1], [0], [0], [1], [0, 0, 1, 1], [], []>} : vector<8x128xbf16>, vector<128x32xbf16>, vector<8x32xf32> -> vector<8x32xf32>
    %cst_62 = arith.constant dense<0.000000e+00> : vector<8x8xf32>
    %89 = tpu.matmul %82, %85, %cst_62 {dimension_numbers = #tpu.dot_dimension_numbers<[1], [1], [0], [0], [0, 0, 1, 0], [], []>} : vector<8x32xf32>, vector<8x32xf32>, vector<8x8xf32> -> vector<8x8xf32>
    %90 = vector.extract_strided_slice %22 {offsets = [2, 0, 0], sizes = [1, 8, 8], strides = [1, 1, 1]} : vector<4x8x8xf32> to vector<1x8x8xf32>
    %91 = vector.shape_cast %90 : vector<1x8x8xf32> to vector<8x8xf32>
    %92 = arith.addf %89, %91 : vector<8x8xf32>
    %cst_63 = arith.constant dense<0xFF800000> : vector<8xf32>
    %93 = vector.multi_reduction <maximumf>, %92, %cst_63 [1] : vector<8x8xf32> to vector<8xf32>
    %94 = vector.shape_cast %93 : vector<8xf32> to vector<8x1xf32>
    %95 = vector.broadcast %94 : vector<8x1xf32> to vector<8x8xf32>
    %96 = arith.subf %92, %95 : vector<8x8xf32>
    %97 = math.exp %96 : vector<8x8xf32>
    %cst_64 = arith.constant dense<0.000000e+00> : vector<8xf32>
    %98 = vector.multi_reduction <add>, %97, %cst_64 [1] : vector<8x8xf32> to vector<8xf32>
    %99 = vector.shape_cast %98 : vector<8xf32> to vector<8x1xf32>
    %100 = tpu.reciprocal %99 {approx = true} : vector<8x1xf32> -> vector<8x1xf32>
    %101 = vector.broadcast %100 : vector<8x1xf32> to vector<8x8xf32>
    %102 = arith.mulf %97, %101 : vector<8x8xf32>
    %cst_65 = arith.constant dense<0.000000e+00> : vector<8x32xf32>
    %103 = tpu.matmul %102, %88, %cst_65 {dimension_numbers = #tpu.dot_dimension_numbers<[1], [0], [0], [1], [0, 0, 1, 1], [], []>} : vector<8x8xf32>, vector<8x32xf32>, vector<8x32xf32> -> vector<8x32xf32>
    %104 = arith.truncf %103 : vector<8x32xf32> to vector<8x32xbf16>
    %c2_66 = arith.constant 2 : index
    %c0_67 = arith.constant 0 : index
    %c0_68 = arith.constant 0 : index
    %105 = vector.load %arg8[%c2_66, %c0_67, %c0_68] : memref<4x32x128xbf16, #tpu.memory_space<vmem>>, vector<1x32x128xbf16>
    %106 = vector.shape_cast %105 : vector<1x32x128xbf16> to vector<32x128xbf16>
    %cst_69 = arith.constant dense<0.000000e+00> : vector<8x128xf32>
    %107 = tpu.matmul %104, %106, %cst_69 {dimension_numbers = #tpu.dot_dimension_numbers<[1], [0], [0], [1], [0, 0, 1, 1], [], []>} : vector<8x32xbf16>, vector<32x128xbf16>, vector<8x128xf32> -> vector<8x128xf32>
    %108 = arith.addf %79, %107 : vector<8x128xf32>
    %c3 = arith.constant 3 : index
    %c0_70 = arith.constant 0 : index
    %c0_71 = arith.constant 0 : index
    %109 = vector.load %arg5[%c3, %c0_70, %c0_71] : memref<4x128x32xbf16, #tpu.memory_space<vmem>>, vector<1x128x32xbf16>
    %110 = vector.shape_cast %109 : vector<1x128x32xbf16> to vector<128x32xbf16>
    %cst_72 = arith.constant dense<0.000000e+00> : vector<8x32xf32>
    %111 = tpu.matmul %17, %110, %cst_72 {dimension_numbers = #tpu.dot_dimension_numbers<[1], [0], [0], [1], [0, 0, 1, 1], [], []>} : vector<8x128xbf16>, vector<128x32xbf16>, vector<8x32xf32> -> vector<8x32xf32>
    %c3_73 = arith.constant 3 : index
    %c0_74 = arith.constant 0 : index
    %c0_75 = arith.constant 0 : index
    %112 = vector.load %arg6[%c3_73, %c0_74, %c0_75] : memref<4x128x32xbf16, #tpu.memory_space<vmem>>, vector<1x128x32xbf16>
    %113 = vector.shape_cast %112 : vector<1x128x32xbf16> to vector<128x32xbf16>
    %cst_76 = arith.constant dense<0.000000e+00> : vector<8x32xf32>
    %114 = tpu.matmul %17, %113, %cst_76 {dimension_numbers = #tpu.dot_dimension_numbers<[1], [0], [0], [1], [0, 0, 1, 1], [], []>} : vector<8x128xbf16>, vector<128x32xbf16>, vector<8x32xf32> -> vector<8x32xf32>
    %c3_77 = arith.constant 3 : index
    %c0_78 = arith.constant 0 : index
    %c0_79 = arith.constant 0 : index
    %115 = vector.load %arg7[%c3_77, %c0_78, %c0_79] : memref<4x128x32xbf16, #tpu.memory_space<vmem>>, vector<1x128x32xbf16>
    %116 = vector.shape_cast %115 : vector<1x128x32xbf16> to vector<128x32xbf16>
    %cst_80 = arith.constant dense<0.000000e+00> : vector<8x32xf32>
    %117 = tpu.matmul %17, %116, %cst_80 {dimension_numbers = #tpu.dot_dimension_numbers<[1], [0], [0], [1], [0, 0, 1, 1], [], []>} : vector<8x128xbf16>, vector<128x32xbf16>, vector<8x32xf32> -> vector<8x32xf32>
    %cst_81 = arith.constant dense<0.000000e+00> : vector<8x8xf32>
    %118 = tpu.matmul %111, %114, %cst_81 {dimension_numbers = #tpu.dot_dimension_numbers<[1], [1], [0], [0], [0, 0, 1, 0], [], []>} : vector<8x32xf32>, vector<8x32xf32>, vector<8x8xf32> -> vector<8x8xf32>
    %119 = vector.extract_strided_slice %22 {offsets = [3, 0, 0], sizes = [1, 8, 8], strides = [1, 1, 1]} : vector<4x8x8xf32> to vector<1x8x8xf32>
    %120 = vector.shape_cast %119 : vector<1x8x8xf32> to vector<8x8xf32>
    %121 = arith.addf %118, %120 : vector<8x8xf32>
    %cst_82 = arith.constant dense<0xFF800000> : vector<8xf32>
    %122 = vector.multi_reduction <maximumf>, %121, %cst_82 [1] : vector<8x8xf32> to vector<8xf32>
    %123 = vector.shape_cast %122 : vector<8xf32> to vector<8x1xf32>
    %124 = vector.broadcast %123 : vector<8x1xf32> to vector<8x8xf32>
    %125 = arith.subf %121, %124 : vector<8x8xf32>
    %126 = math.exp %125 : vector<8x8xf32>
    %cst_83 = arith.constant dense<0.000000e+00> : vector<8xf32>
    %127 = vector.multi_reduction <add>, %126, %cst_83 [1] : vector<8x8xf32> to vector<8xf32>
    %128 = vector.shape_cast %127 : vector<8xf32> to vector<8x1xf32>
    %129 = tpu.reciprocal %128 {approx = true} : vector<8x1xf32> -> vector<8x1xf32>
    %130 = vector.broadcast %129 : vector<8x1xf32> to vector<8x8xf32>
    %131 = arith.mulf %126, %130 : vector<8x8xf32>
    %cst_84 = arith.constant dense<0.000000e+00> : vector<8x32xf32>
    %132 = tpu.matmul %131, %117, %cst_84 {dimension_numbers = #tpu.dot_dimension_numbers<[1], [0], [0], [1], [0, 0, 1, 1], [], []>} : vector<8x8xf32>, vector<8x32xf32>, vector<8x32xf32> -> vector<8x32xf32>
    %133 = arith.truncf %132 : vector<8x32xf32> to vector<8x32xbf16>
    %c3_85 = arith.constant 3 : index
    %c0_86 = arith.constant 0 : index
    %c0_87 = arith.constant 0 : index
    %134 = vector.load %arg8[%c3_85, %c0_86, %c0_87] : memref<4x32x128xbf16, #tpu.memory_space<vmem>>, vector<1x32x128xbf16>
    %135 = vector.shape_cast %134 : vector<1x32x128xbf16> to vector<32x128xbf16>
    %cst_88 = arith.constant dense<0.000000e+00> : vector<8x128xf32>
    %136 = tpu.matmul %133, %135, %cst_88 {dimension_numbers = #tpu.dot_dimension_numbers<[1], [0], [0], [1], [0, 0, 1, 1], [], []>} : vector<8x32xbf16>, vector<32x128xbf16>, vector<8x128xf32> -> vector<8x128xf32>
    %137 = arith.addf %108, %136 : vector<8x128xf32>
    %138 = arith.addf %3, %137 : vector<8x128xf32>
    %139 = arith.mulf %138, %138 : vector<8x128xf32>
    %cst_89 = arith.constant dense<0.000000e+00> : vector<8xf32>
    %140 = vector.multi_reduction <add>, %139, %cst_89 [1] : vector<8x128xf32> to vector<8xf32>
    %141 = vector.shape_cast %140 : vector<8xf32> to vector<8x1xf32>
    %cst_90 = arith.constant 1.280000e+02 : f32
    %142 = vector.broadcast %cst_90 : f32 to vector<8x1xf32>
    %143 = arith.divf %141, %142 : vector<8x1xf32>
    %cst_91 = arith.constant 9.99999997E-7 : f32
    %144 = vector.broadcast %cst_91 : f32 to vector<8x1xf32>
    %145 = arith.addf %143, %144 : vector<8x1xf32>
    %146 = math.rsqrt %145 : vector<8x1xf32>
    %147 = vector.broadcast %146 : vector<8x1xf32> to vector<8x128xf32>
    %148 = arith.mulf %138, %147 : vector<8x128xf32>
    %c0_92 = arith.constant 0 : index
    %c0_93 = arith.constant 0 : index
    %149 = vector.load %arg9[%c0_92, %c0_93] : memref<1x128xf32, #tpu.memory_space<vmem>>, vector<1x128xf32>
    %150 = vector.broadcast %149 : vector<1x128xf32> to vector<8x128xf32>
    %151 = arith.mulf %148, %150 : vector<8x128xf32>
    %152 = arith.truncf %151 : vector<8x128xf32> to vector<8x128xbf16>
    %c0_94 = arith.constant 0 : index
    %c0_95 = arith.constant 0 : index
    %153 = vector.load %arg10[%c0_94, %c0_95] : memref<128x256xbf16, #tpu.memory_space<vmem>>, vector<128x256xbf16>
    %cst_96 = arith.constant dense<0.000000e+00> : vector<8x256xf32>
    %154 = tpu.matmul %152, %153, %cst_96 {dimension_numbers = #tpu.dot_dimension_numbers<[1], [0], [0], [1], [0, 0, 1, 1], [], []>} : vector<8x128xbf16>, vector<128x256xbf16>, vector<8x256xf32> -> vector<8x256xf32>
    %cst_97 = arith.constant 0.000000e+00 : f32
    %155 = vector.broadcast %cst_97 : f32 to vector<8x256xf32>
    %156 = arith.maximumf %154, %155 : vector<8x256xf32>
    %157 = arith.truncf %156 : vector<8x256xf32> to vector<8x256xbf16>
    %c0_98 = arith.constant 0 : index
    %c0_99 = arith.constant 0 : index
    %158 = vector.load %arg11[%c0_98, %c0_99] : memref<256x128xbf16, #tpu.memory_space<vmem>>, vector<256x128xbf16>
    %cst_100 = arith.constant dense<0.000000e+00> : vector<8x128xf32>
    %159 = tpu.matmul %157, %158, %cst_100 {dimension_numbers = #tpu.dot_dimension_numbers<[1], [0], [0], [1], [0, 0, 1, 1], [], []>} : vector<8x256xbf16>, vector<256x128xbf16>, vector<8x128xf32> -> vector<8x128xf32>
    %160 = arith.addf %138, %159 : vector<8x128xf32>
    %161 = arith.truncf %160 : vector<8x128xf32> to vector<8x128xbf16>
    %c0_101 = arith.constant 0 : index
    %c0_102 = arith.constant 0 : index
    %c0_103 = arith.constant 0 : index
    %162 = vector.load %arg12[%c0_101, %c0_102, %c0_103] : memref<1x8x128xbf16, #tpu.memory_space<vmem>>, vector<1x8x128xbf16>
    %163 = vector.shape_cast %162 : vector<1x8x128xbf16> to vector<8x128xbf16>
    %164 = vector.shape_cast %161 : vector<8x128xbf16> to vector<1x8x128xbf16>
    tpu.vector_store %arg12[%c0_101, %c0_102, %c0_103], %164 {strides = array<i32>} : memref<1x8x128xbf16, #tpu.memory_space<vmem>>, vector<1x8x128xbf16>,
    return
  }
  func.func @transform_0(%arg0: i32) -> (i32, i32, i32) {
    %c0_i32 = arith.constant 0 : i32
    %c0_i32_0 = arith.constant 0 : i32
    %c0_i32_1 = arith.constant 0 : i32
    return %arg0, %c0_i32, %c0_i32_0 : i32, i32, i32
  }
  func.func @transform_1(%arg0: i32) -> (i32, i32, i32) {
    %c0_i32 = arith.constant 0 : i32
    %c0_i32_0 = arith.constant 0 : i32
    %c0_i32_1 = arith.constant 0 : i32
    %c0_i32_2 = arith.constant 0 : i32
    return %c0_i32, %c0_i32_0, %c0_i32_1 : i32, i32, i32
  }
  func.func @transform_2(%arg0: i32) -> (i32, i32, i32) {
    %c0_i32 = arith.constant 0 : i32
    %c0_i32_0 = arith.constant 0 : i32
    %c0_i32_1 = arith.constant 0 : i32
    return %arg0, %c0_i32, %c0_i32_0 : i32, i32, i32
  }
  func.func @transform_3(%arg0: i32) -> (i32, i32) {
    %c0_i32 = arith.constant 0 : i32
    %c0_i32_0 = arith.constant 0 : i32
    %c0_i32_1 = arith.constant 0 : i32
    return %c0_i32, %c0_i32_0 : i32, i32
  }
  func.func @transform_4(%arg0: i32) -> (i32, i32, i32) {
    %c0_i32 = arith.constant 0 : i32
    %c0_i32_0 = arith.constant 0 : i32
    %c0_i32_1 = arith.constant 0 : i32
    %c0_i32_2 = arith.constant 0 : i32
    return %c0_i32, %c0_i32_0, %c0_i32_1 : i32, i32, i32
  }
  func.func @transform_5(%arg0: i32) -> (i32, i32, i32) {
    %c0_i32 = arith.constant 0 : i32
    %c0_i32_0 = arith.constant 0 : i32
    %c0_i32_1 = arith.constant 0 : i32
    %c0_i32_2 = arith.constant 0 : i32
    return %c0_i32, %c0_i32_0, %c0_i32_1 : i32, i32, i32
  }
  func.func @transform_6(%arg0: i32) -> (i32, i32, i32) {
    %c0_i32 = arith.constant 0 : i32
    %c0_i32_0 = arith.constant 0 : i32
    %c0_i32_1 = arith.constant 0 : i32
    %c0_i32_2 = arith.constant 0 : i32
    return %c0_i32, %c0_i32_0, %c0_i32_1 : i32, i32, i32
  }
  func.func @transform_7(%arg0: i32) -> (i32, i32, i32) {
    %c0_i32 = arith.constant 0 : i32
    %c0_i32_0 = arith.constant 0 : i32
    %c0_i32_1 = arith.constant 0 : i32
    %c0_i32_2 = arith.constant 0 : i32
    return %c0_i32, %c0_i32_0, %c0_i32_1 : i32, i32, i32
  }
  func.func @transform_8(%arg0: i32) -> (i32, i32) {
    %c0_i32 = arith.constant 0 : i32
    %c0_i32_0 = arith.constant 0 : i32
    %c0_i32_1 = arith.constant 0 : i32
    return %c0_i32, %c0_i32_0 : i32, i32
  }
  func.func @transform_9(%arg0: i32) -> (i32, i32) {
    %c0_i32 = arith.constant 0 : i32
    %c0_i32_0 = arith.constant 0 : i32
    %c0_i32_1 = arith.constant 0 : i32
    return %c0_i32, %c0_i32_0 : i32, i32
  }
  func.func @transform_10(%arg0: i32) -> (i32, i32) {
    %c0_i32 = arith.constant 0 : i32
    %c0_i32_0 = arith.constant 0 : i32
    %c0_i32_1 = arith.constant 0 : i32
    return %c0_i32, %c0_i32_0 : i32, i32
  }
  func.func @transform_11(%arg0: i32) -> (i32, i32, i32) {
    %c0_i32 = arith.constant 0 : i32
    %c0_i32_0 = arith.constant 0 : i32
    %c0_i32_1 = arith.constant 0 : i32
    return %arg0, %c0_i32, %c0_i32_0 : i32, i32, i32
  }
}

</mosaic_0001>

<bundles_post_ra>
// kernel: t5_encoder_with_projection.5
= control target key start
LH: loop header
LB: loop body
LE: loop exit
PB: predicated region body
PF: predicated region fallthrough
CT: control target
= control target key end

     0   :  { %9 = vsyncpa [#allocation3], 0  ;;  %s884_s0 = inlined_call_operand.vmem [shape: bf16[2,8,128], index: 0, kind: input, shape index: {}]   ;;  %s885_s1 = inlined_call_operand.vmem [shape: f32[1,128], index: 1, kind: input, shape index: {}]   ;;  %s886_s2 = inlined_call_operand.vmem [shape: bf16[128,128], index: 2, kind: input, shape index: {}]   ;;  %s887_s3 = inlined_call_operand.vmem [shape: bf16[128,128], index: 3, kind: input, shape index: {}]   ;;  %s888_s4 = inlined_call_operand.hbm [shape: f32[2,8,128], index: 4, kind: output, shape index: {}]  }
   0x1   :  { %11 = vsyncpa [#allocation3 + $0x1], 0  ;;  %s733_s15 = smov 0   ;;  %s735_s16 = smov 0  }
   0x2   :  { %s737_s17 = smov 0   ;;  %s739_s18 = smov 0  }
   0x3 LB: > { %s754_s19 = sadd.s32 4294967295, %s703_s18   ;;  %s497_s20 = sadd.s32 4294967294, %s703_s18   ;;  %s703_s18 = sphi %s739_s18, %s894_s18   ;;  %s699_s17 = sphi %s737_s17, %s893_s17   ;;  %s695_s16 = sphi %s735_s16, %s892_s16   ;;  %s691_s15 = sphi %s733_s15, %s891_s15  }
   0x4   : > { %s758_s21 = sadd.s32 1, %s703_s18   ;;  %s113_s22 = sadd.s32 1, %s699_s17 }
   0x5   : > { %s110_s23 = ssub.s32 %s703_s18, %s758_s21  ;;  %p123_p0 = scmp.ne.s32.totalorder %s699_s17, %s695_s16 }
   0x6   : > { %p111_p1 = scmp.eq.s32.totalorder %s110_s23, 0  ;;  %p124_p2 = scmp.eq.s32.totalorder %s754_s19, 1 }
   0x7   : > { %p129_p3 = scmp.ne.s32.totalorder %s695_s16, %s691_s15  ;;  %p130_p4 = scmp.eq.s32.totalorder %s497_s20, 1 }
   0x8   : > { %s769_s24 = scalar_select %p111_p1, %s699_s17, %s113_s22  }
   0x9   : > { %p771_p5 = por %p124_p2, %p123_p0  ;;  %p775_p6 = por %p130_p4, %p129_p3 }
   0xa   : > { %p500_p7 = scmp.ge.s32.totalorder %s703_s18, 1  ;;  %p164_p8 = scmp.lt.s32.totalorder %s703_s18, 3 }
   0xc   : > { %p165_p9 = pnand %p500_p7, %p164_p8 }
   0xd   : > { %p189_p10 = scmp.lt.s32.totalorder (!%p165_p9), %s754_s19, 1  ;;  %v705_v0 = vmov (!%p165_p9), 0.0   ;;  %v623_v1 = vld [vmem:[%s886_s2] sm:$0xff] (!%p165_p9)   ;;  %v624_v2 = vld [vmem:[%s886_s2 + $0x8] sm:$0xff] (!%p165_p9)   ;;  %v625_v3 = vld [vmem:[%s886_s2 + $0x10] sm:$0xff] (!%p165_p9)   ;;  %vm706_vm0 = vmmov (!%p165_p9), 0  }
   0xe   : > { %168 = sbr.rel (%p165_p9) target bundleno = 636 (0x27c), region = 36  ;;  %542 = vmatprep.subr.bf16.mxu0 (!%p165_p9), %v705_v0  ;;  %562 = vmatprep.subr.bf16.mxu1 (!%p165_p9), %v705_v0  ;;  %v626_v7 = vld [vmem:[%s886_s2 + $0x18] sm:$0xff] (!%p165_p9)   ;;  %v627_v8 = vld [vmem:[%s886_s2 + $0x20] sm:$0xff] (!%p165_p9)   ;;  %v628_v9 = vld [vmem:[%s886_s2 + $0x28] sm:$0xff] (!%p165_p9)   ;;  %s521_s10 = sshll.u32 (!%p165_p9), %s754_s19, 7 }
   0xf   : > { %543 = vmatpush3.bf16.msra.mxu0 (!%p165_p9), %v623_v1  ;;  %558 = vmatprep.mubr.msk.bf16.mxu0 (!%p165_p9), %vm706_vm0, %v705_v0  ;;  %v629_v10 = vld [vmem:[%s886_s2 + $0x30] sm:$0xff] (!%p165_p9)   ;;  %v630_v11 = vld [vmem:[%s886_s2 + $0x38] sm:$0xff] (!%p165_p9)   ;;  %v631_v12 = vld [vmem:[%s887_s3] sm:$0xff] (!%p165_p9)   ;;  %s844_s13 = scalar_lea.hbm (!%p165_p9), %s888_s4, %s521_s10 }
  0x10   : > { %544 = vmatprep.subr.bf16.mxu0 (!%p165_p9), %v705_v0  ;;  %578 = vmatprep.mubr.msk.bf16.mxu1 (!%p165_p9), %vm706_vm0, %v705_v0  ;;  %v632_v13 = vld [vmem:[%s887_s3 + $0x8] sm:$0xff] (!%p165_p9)   ;;  %v633_v14 = vld [vmem:[%s887_s3 + $0x10] sm:$0xff] (!%p165_p9)   ;;  %v634_v15 = vld [vmem:[%s887_s3 + $0x18] sm:$0xff] (!%p165_p9)  }
  0x11   : > { %563 = vmatpush3.bf16.msra.mxu1 (!%p165_p9), %v631_v12  ;;  %v635_v16 = vld [vmem:[%s887_s3 + $0x20] sm:$0xff] (!%p165_p9)   ;;  %v636_v17 = vld [vmem:[%s887_s3 + $0x28] sm:$0xff] (!%p165_p9)   ;;  %v637_v18 = vld [vmem:[%s887_s3 + $0x30] sm:$0xff] (!%p165_p9)  }
  0x12   : > { %564 = vmatprep.subr.bf16.mxu1 (!%p165_p9), %v705_v0  ;;  %v503_v23 = vld [vmem:[%s885_s1] ss:$0 sm:$0xff] (!%p165_p9)  ;;  %v638_v27 = vld [vmem:[%s887_s3 + $0x38] sm:$0xff] (!%p165_p9)  }
  0x13   : > { %545 = vmatpush3.bf16.msra.mxu0 (!%p165_p9), %v624_v2 }
  0x14   : > { %546 = vmatprep.subr.bf16.mxu0 (!%p165_p9), %v705_v0 }
  0x15   : > { %s190_s29 = scalar_select %p189_p10, %s754_s19, 1  ;;  %565 = vmatpush3.bf16.msra.mxu1 %v632_v13 }
  0x16   : > { %566 = vmatprep.subr.bf16.mxu1 %v705_v0  ;;  %s707_s19 = smov [#allocation2]  }
  0x17   : > { %s502_s6 = sshll.u32 %s190_s29, 2  ;;  %547 = vmatpush3.bf16.msra.mxu0 %v625_v3  ;;  %s645_s22 = sshll.u32 %s707_s19, 4  ;;  %s646_s22 = int_to_ptr.vmem [resolvable:$false] %s645_s22 }
  0x18   : > { %s192_s9 = scalar_lea.vmem %s884_s0, %s502_s6  ;;  %548 = vmatprep.subr.bf16.mxu0 %v705_v0  ;;  %s186_s6 = sand.u32 1, %s695_s16  }
  0x19   : > { %v194_v4 = vld [vmem:[%s192_s9] sm:$0xf]  ;;  %567 = vmatpush3.bf16.msra.mxu1 %v633_v14  ;;  %s501_s7 = sshll.u32 %s186_s6, 3  ;;  %s425_s14 = scalar_lea.sflag [#allocation3], %s186_s6 }
  0x1a   : > { %v195_v5 = vunpack.c.l.bf16 %v194_v4  ;;  %568 = vmatprep.subr.bf16.mxu1 %v705_v0  ;;  %s188_s8 = scalar_lea.vmem [#allocation2], %s501_s7  ;;  %s647_s23 = scalar_lea.vmem %s646_s22, 256 }
  0x1b   : > { %549 = vmatpush3.bf16.msra.mxu0 %v626_v7  ;;  %s438_s9 = sshll.u32 %s188_s8, 4  ;;  %s839_s9 = int_to_ptr.vmem [resolvable:$true] %s438_s9 }
  0x1c   : > { %v196_v6 = vmul.f32 %v195_v5, %v195_v5  ;;  %550 = vmatprep.subr.bf16.mxu0 %v705_v0  ;;  %s641_s20 = scalar_lea.vmem %s839_s9, 128  ;;  %p648_p0 = scmp.lt.s32.totalorder %s839_s9, %s646_s22 }
  0x1d   : > { %569 = vmatpush3.bf16.msra.mxu1 %v634_v15  ;;  %p642_p11 = scmp.ne.s32.totalorder %s839_s9, %s641_s20  ;;  %p649_p1 = scmp.lt.s32.totalorder %s647_s23, %s641_s20 }
  0x1e   : > { %197 = vadd.xlane.f32.xlu0 %v196_v6  ;;  %570 = vmatprep.subr.bf16.mxu1 %v705_v0 }
  0x1f   : > { %551 = vmatpush3.bf16.msra.mxu0 %v627_v8  ;;  %p643_p12 = pnand %p642_p11, %p771_p5  ;;  %p650_p2 = por %p649_p1, %p648_p0 }
  0x20   : > { %552 = vmatprep.subr.bf16.mxu0 %v705_v0 }
  0x21   : > { %571 = vmatpush3.bf16.msra.mxu1 %v635_v16  ;;  %p644_p13 = pneg %p643_p12 }
  0x22   : > { %572 = vmatprep.subr.bf16.mxu1 %v705_v0 }
  0x23   : > { %553 = vmatpush3.bf16.msra.mxu0 %v628_v9  ;;  %p651_p3 = pnand %p650_p2, %p644_p13 }
  0x24   : > { %554 = vmatprep.subr.bf16.mxu0 %v705_v0 }
  0x25   : > { %573 = vmatpush3.bf16.msra.mxu1 %v636_v17 }
  0x26   : > { %574 = vmatprep.subr.bf16.mxu1 %v705_v0 }
  0x27   : > { %555 = vmatpush3.bf16.msra.mxu0 %v629_v10 }
  0x28   : > { %556 = vmatprep.subr.bf16.mxu0 %v705_v0 }
  0x29   : > { %575 = vmatpush3.bf16.msra.mxu1 %v637_v18 }
  0x2a   : > { %576 = vmatprep.subr.bf16.mxu1 %v705_v0 }
  0x2b   : > { %557 = vmatpush3.bf16.msra.mxu0 %v630_v11 }
  0x2d   : > { %577 = vmatpush3.bf16.msra.mxu1 %v638_v27 }
  0xab   : > { %v198_v19 = vpop.xlane.xlu0 %197 }
  0xac   : > { %v200_v20 = vmul.f32 0.0078125, %v198_v19 }
  0xae   : > { %v201_v21 = vadd.f32 1e-06, %v200_v20 }
  0xb0   : > { %639 = vrsqrt.f32 %v201_v21 }
  0xba   : > { %v640_v22 = vpop.eup %639 }
  0xbb   : > { %v203_v24 = vmul.f32 %v640_v22, %v195_v5 }
  0xbd   : > { %v211_v25 = vmul.f32 %v503_v23, %v203_v24 }
  0xbf   : > { %v212_v26 = vpack.c.bf16 %v211_v25, %v211_v25 }
  0xc1   : > { %559 = vmatmul.mubr.bf16.vlgmr.msra.gmra.mrb[0].mxu0 %v212_v26 }
 0x194   : > { %v311_v28 = vpop.f32.mrb[0].mxu0 }
 0x195   : > { %v317_v29 = vmax.f32 %v311_v28, 0.0  ;;  %v560_v30 = vpop.f32.mrb[1].mxu0 }
 0x196   : > { %v314_v31 = vpop.f32.mrb[2].mxu0 }
 0x197   : > { %v318_v32 = vpack.c.bf16 %v317_v29, %v317_v29  ;;  %v561_v33 = vpop.f32.mrb[3].mxu0 }
 0x199   : > { %579 = vmatmul.mubr.bf16.vlgmr.msra.gmra.mrb[0].mxu1 %v318_v32 }
 0x26c   : > { %v417_v34 = vpop.f32.mrb[0].mxu1 }
 0x26d   : > { %423 = vst [vmem:[%s188_s8] sm:$0xff] %v417_v34  ;;  %v580_v35 = vpop.f32.mrb[1].mxu1 }
 0x26e   : > { %v420_v36 = vpop.f32.mrb[2].mxu1 }
 0x26f   : > { %654 = shalt.err (!%p651_p3)
}
 0x270   : > { %s655_s27 = scalar_lea.hbm %s844_s13, 128  ;;  %s659_s30 = scalar_lea.hbm %s888_s4, 256 }
 0x271   : > { %p656_p4 = scmp.ne.s32.totalorder %s844_s13, %s655_s27  ;;  %p660_p9 = scmp.lt.u32.totalorder %s844_s13, %s888_s4 }
 0x272   : > { %p661_p10 = scmp.lt.u32.totalorder %s659_s30, %s655_s27  ;;  %p663_p12 = scmp.lt.u32.totalorder %s655_s27, %s844_s13 }
 0x273   : > { %p657_p7 = pnand %p656_p4, %p771_p5 }
 0x274   : > { %p662_p11 = por %p661_p10, %p660_p9 }
 0x275   : > { %p658_p8 = pneg %p657_p7 }
 0x276   : > { %p664_p13 = por %p663_p12, %p662_p11 }
 0x278   : > { %p665_p0 = pnand %p664_p13, %p658_p8 }
 0x27a   : > { %668 = shalt.err (!%p665_p0)
}
 0x27b   : > { %582 = dma.vmem_to_hbm [thread:$0]  (%p771_p5), %s839_s9, 128, %s844_s13, %s425_s14   ;;  %v581_v37 = vpop.f32.mrb[3].mxu1 }
 0x27c PF: > { %p588_p1 = scmp.ge.s32.totalorder %s703_s18, 2  ;;  %s450_s7 = sand.u32 1, %s691_s15  }
 0x27d   : > { %s451_s8 = scalar_lea.sflag [#allocation3], %s450_s7 }
 0x27e   : > { %p585_p2 = pnand %p588_p1, %p775_p6 }
 0x280   : > { %686 = dma.done.wait (!%p585_p2), %s451_s8, 128  }
 0x281   : > { %688 = vsyncadd (!%p585_p2), %s451_s8, 4294967168  ;;  %p14_p3 = scmp.ge.s32.totalorder %s758_s21, 4   ;;  %s891_s15 = smov %s695_s16 }
 0x282   : > { %s892_s16 = smov %s699_s17  ;;  %s893_s17 = smov %s769_s24 }
 0x283   : > { %s894_s18 = smov %s758_s21  ;;  %16 = sbr.rel (!%p14_p3) target bundleno = 3 (0x3), region = 71 }
 0x28a   :  { %456 = vsyncpa [#allocation3], 1 }
 0x28b   :  { %458 = vsyncpa [#allocation3 + $0x1], 1 }

// kernel: t5_encoder_with_projection.3
= control target key start
LH: loop header
LB: loop body
LE: loop exit
PB: predicated region body
PF: predicated region fallthrough
CT: control target
= control target key end

     0   :  { %s4002_s17 = smov 0   ;;  %s4678_s0 = inlined_call_operand.vmem [shape: bf16[2,8,128], index: 0, kind: input, shape index: {}]   ;;  %s4679_s1 = inlined_call_operand.vmem [shape: f32[4,8,8], index: 1, kind: input, shape index: {}]   ;;  %s4680_s2 = inlined_call_operand.vmem [shape: f32[2,1,8], index: 2, kind: input, shape index: {}]   ;;  %s4681_s3 = inlined_call_operand.vmem [shape: f32[1,128], index: 3, kind: input, shape index: {}]   ;;  %s4682_s4 = inlined_call_operand.vmem [shape: bf16[4,128,32], index: 4, kind: input, shape index: {}]   ;;  %s4683_s5 = inlined_call_operand.vmem [shape: bf16[4,128,32], index: 5, kind: input, shape index: {}]   ;;  %s4684_s6 = inlined_call_operand.vmem [shape: bf16[4,128,32], index: 6, kind: input, shape index: {}]   ;;  %s4685_s7 = inlined_call_operand.vmem [shape: bf16[4,32,128], index: 7, kind: input, shape index: {}]   ;;  %s4686_s8 = inlined_call_operand.vmem [shape: f32[1,128], index: 8, kind: input, shape index: {}]   ;;  %s4687_s9 = inlined_call_operand.vmem [shape: bf16[128,256], index: 9, kind: input, shape index: {}]   ;;  %s4688_s10 = inlined_call_operand.vmem [shape: bf16[256,128], index: 10, kind: input, shape index: {}]   ;;  %s4689_s11 = inlined_call_operand.vmem [shape: bf16[2,8,128], index: 11, kind: output, shape index: {}]  }
   0x1 LB: > { %s2966_s18 = sadd.s32 4294967295, %s3937_s17   ;;  %p2970_p0 = scmp.ge.s32.totalorder %s3937_s17, 1  ;;  %s3937_s17 = sphi %s4002_s17, %s21_s17  }
   0x2   : > { %p344_p1 = scmp.lt.s32.totalorder %s3937_s17, 3 }
   0x4   : > { %p345_p2 = pnand %p2970_p0, %p344_p1 }
   0x5   : > { %p385_p3 = scmp.lt.s32.totalorder (!%p345_p2), %s2966_s18, 1  ;;  %v3939_v0 = vmov (!%p345_p2), 0.0   ;;  %v3767_v1 = vld [vmem:[%s4682_s4] sm:$0xff] (!%p345_p2)   ;;  %v3769_v3 = vld [vmem:[%s4682_s4 + $0x8] sm:$0xff] (!%p345_p2)   ;;  %v3771_v6 = vld [vmem:[%s4682_s4 + $0x10] sm:$0xff] (!%p345_p2)   ;;  %vm3940_vm0 = vmmov (!%p345_p2), 0  }
   0x6   : > { %348 = sbr.rel (%p345_p2) target bundleno = 4704 (0x1260), region = 64  ;;  %3444 = vmatprep.subr.bf16.mxu0 (!%p345_p2), %v3939_v0  ;;  %3464 = vmatprep.subr.bf16.mxu1 (!%p345_p2), %v3939_v0  ;;  %v3768_v2 = vld [vmem:[%s4683_s5] sm:$0xff] (!%p345_p2)   ;;  %v3770_v4 = vld [vmem:[%s4683_s5 + $0x8] sm:$0xff] (!%p345_p2)   ;;  %v3772_v7 = vld [vmem:[%s4683_s5 + $0x10] sm:$0xff] (!%p345_p2)   ;;  %vm743_vm1 = vcmask (!%p345_p2), 261120   ;;  %vm820_vm2 = vcmask (!%p345_p2), 64512  }
   0x7   : > { %3445 = vmatpush3.bf16.msra.mxu0 (!%p345_p2), %v3767_v1  ;;  %3465 = vmatpush3.bf16.msra.mxu1 (!%p345_p2), %v3768_v2  ;;  %v3773_v10 = vld [vmem:[%s4682_s4 + $0x18] sm:$0xff] (!%p345_p2)   ;;  %v3775_v12 = vld [vmem:[%s4682_s4 + $0x20] sm:$0xff] (!%p345_p2)   ;;  %v3777_v14 = vld [vmem:[%s4682_s4 + $0x28] sm:$0xff] (!%p345_p2)  }
   0x8   : > { %3446 = vmatprep.subr.bf16.mxu0 (!%p345_p2), %v3939_v0  ;;  %3466 = vmatprep.subr.bf16.mxu1 (!%p345_p2), %v3939_v0  ;;  %v3774_v11 = vld [vmem:[%s4683_s5 + $0x18] sm:$0xff] (!%p345_p2)   ;;  %v3776_v13 = vld [vmem:[%s4683_s5 + $0x20] sm:$0xff] (!%p345_p2)   ;;  %v3778_v15 = vld [vmem:[%s4683_s5 + $0x28] sm:$0xff] (!%p345_p2)  }
   0x9   : > { %v3779_v16 = vld [vmem:[%s4682_s4 + $0x30] sm:$0xff] (!%p345_p2)   ;;  %v3781_v18 = vld [vmem:[%s4682_s4 + $0x38] sm:$0xff] (!%p345_p2)   ;;  %3460 = vmatprep.mubr.msk.bf16.mxu0 (!%p345_p2), %vm3940_vm0, %v3939_v0  ;;  %3480 = vmatprep.mubr.msk.bf16.mxu1 (!%p345_p2), %vm3940_vm0, %v3939_v0  ;;  %v2973_v24 = vld [vmem:[%s4681_s3] ss:$0 sm:$0xff] (!%p345_p2) }
   0xa   : > { %v3780_v17 = vld [vmem:[%s4683_s5 + $0x30] sm:$0xff] (!%p345_p2)   ;;  %v3782_v19 = vld [vmem:[%s4683_s5 + $0x38] sm:$0xff] (!%p345_p2)   ;;  %v3783_v27 = vld [vmem:[%s4684_s6] sm:$0xff] (!%p345_p2)  }
   0xb   : > { %3447 = vmatpush3.bf16.msra.mxu0 (!%p345_p2), %v3769_v3  ;;  %3467 = vmatpush3.bf16.msra.mxu1 (!%p345_p2), %v3770_v4  ;;  %v3784_v29 = vld [vmem:[%s4684_s6 + $0x8] sm:$0xff] (!%p345_p2)   ;;  %v3785_v30 = vld [vmem:[%s4684_s6 + $0x10] sm:$0xff] (!%p345_p2)   ;;  %v3786_v31 = vld [vmem:[%s4684_s6 + $0x18] sm:$0xff] (!%p345_p2)  }
   0xc   : > { %3448 = vmatprep.subr.bf16.mxu0 (!%p345_p2), %v3939_v0  ;;  %3468 = vmatprep.subr.bf16.mxu1 (!%p345_p2), %v3939_v0  ;;  %v3787_v32 = vld [vmem:[%s4684_s6 + $0x20] sm:$0xff] (!%p345_p2)   ;;  %v3788_v33 = vld [vmem:[%s4684_s6 + $0x28] sm:$0xff] (!%p345_p2)   ;;  %v3789_v34 = vld [vmem:[%s4684_s6 + $0x30] sm:$0xff] (!%p345_p2)  }
   0xd   : > { %s4691_s18 = smov (!%p385_p3, %s2966_s18), 1  ;;  %v3790_v35 = vld [vmem:[%s4684_s6 + $0x38] sm:$0xff]   ;;  %v3791_v36 = vld [vmem:[%s4683_s5 + $0x40] sm:$0xff]   ;;  %v3792_v37 = vld [vmem:[%s4683_s5 + $0x48] sm:$0xff]  }
   0xe   : > { %s2971_s25 = sshll.u32 %s4691_s18, 2  ;;  %v3793_v38 = vld [vmem:[%s4683_s5 + $0x50] sm:$0xff]   ;;  %v3794_v39 = vld [vmem:[%s4683_s5 + $0x58] sm:$0xff]   ;;  %v3795_v40 = vld [vmem:[%s4683_s5 + $0x60] sm:$0xff]   ;;  %s391_s27 = scalar_lea.vmem %s4680_s2, %s4691_s18 }
   0xf   : > { %s388_s30 = scalar_lea.vmem %s4678_s0, %s2971_s25  ;;  %3449 = vmatpush3.bf16.msra.mxu0 %v3771_v6  ;;  %3469 = vmatpush3.bf16.msra.mxu1 %v3772_v7  ;;  %v3796_v41 = vld [vmem:[%s4683_s5 + $0x68] sm:$0xff]   ;;  %v3797_v42 = vld [vmem:[%s4683_s5 + $0x70] sm:$0xff]   ;;  %v3798_v43 = vld [vmem:[%s4683_s5 + $0x78] sm:$0xff]   ;;  %s395_s23 = scalar_lea.vmem %s4689_s11, %s2971_s25 }
  0x10   : > { %v401_v5 = vld [vmem:[%s388_s30] sm:$0xf]  ;;  %3450 = vmatprep.subr.bf16.mxu0 %v3939_v0  ;;  %3470 = vmatprep.subr.bf16.mxu1 %v3939_v0 }
  0x11   : > { %v4040_v8 = vunpack.c.l.bf16 %v401_v5  ;;  %v397_v60 = vld [vmem:[%s4679_s1] sm:$0xff] }
  0x12   : > { %v4189_v61 = vld [vmem:[%s391_s27] ss:$0 sm:$0xff] }
  0x13   : > { %v403_v9 = vmul.f32 %v4040_v8, %v4040_v8  ;;  %3451 = vmatpush3.bf16.msra.mxu0 %v3773_v10  ;;  %3471 = vmatpush3.bf16.msra.mxu1 %v3774_v11  ;;  %v427_v62 = vadd.f32 %v4189_v61, %v397_v60 }
  0x14   : > { %3452 = vmatprep.subr.bf16.mxu0 %v3939_v0  ;;  %3472 = vmatprep.subr.bf16.mxu1 %v3939_v0 }
  0x15   : > { %404 = vadd.xlane.f32.xlu0 %v403_v9 }
  0x17   : > { %3453 = vmatpush3.bf16.msra.mxu0 %v3775_v12  ;;  %3473 = vmatpush3.bf16.msra.mxu1 %v3776_v13  ;;  %v3799_v12 = vld [vmem:[%s4682_s4 + $0x40] sm:$0xff]  }
  0x18   : > { %3454 = vmatprep.subr.bf16.mxu0 %v3939_v0  ;;  %3474 = vmatprep.subr.bf16.mxu1 %v3939_v0 }
  0x1b   : > { %3455 = vmatpush3.bf16.msra.mxu0 %v3777_v14  ;;  %3475 = vmatpush3.bf16.msra.mxu1 %v3778_v15  ;;  %v3800_v14 = vld [vmem:[%s4682_s4 + $0x48] sm:$0xff]   ;;  %v3801_v15 = vld [vmem:[%s4682_s4 + $0x50] sm:$0xff]  }
  0x1c   : > { %3456 = vmatprep.subr.bf16.mxu0 %v3939_v0  ;;  %3476 = vmatprep.subr.bf16.mxu1 %v3939_v0 }
  0x1f   : > { %3457 = vmatpush3.bf16.msra.mxu0 %v3779_v16  ;;  %3477 = vmatpush3.bf16.msra.mxu1 %v3780_v17  ;;  %v3802_v16 = vld [vmem:[%s4682_s4 + $0x58] sm:$0xff]   ;;  %v3803_v17 = vld [vmem:[%s4682_s4 + $0x60] sm:$0xff]  }
  0x20   : > { %3458 = vmatprep.subr.bf16.mxu0 %v3939_v0  ;;  %3478 = vmatprep.subr.bf16.mxu1 %v3939_v0 }
  0x23   : > { %3459 = vmatpush3.bf16.msra.mxu0 %v3781_v18  ;;  %3479 = vmatpush3.bf16.msra.mxu1 %v3782_v19  ;;  %v3804_v18 = vld [vmem:[%s4682_s4 + $0x68] sm:$0xff]   ;;  %v3805_v19 = vld [vmem:[%s4682_s4 + $0x70] sm:$0xff]  }
  0x24   : > { %3484 = vmatprep.subr.bf16.mxu0 %v3939_v0  ;;  %3504 = vmatprep.subr.mxu1 %v3939_v0 }
  0xa2   : > { %v405_v20 = vpop.xlane.xlu0 %404 }
  0xa3   : > { %v407_v21 = vmul.f32 0.0078125, %v405_v20  ;;  %v3806_v20 = vld [vmem:[%s4682_s4 + $0x78] sm:$0xff]  }
  0xa5   : > { %v408_v22 = vadd.f32 1e-06, %v407_v21  ;;  %v3807_v21 = vld [vmem:[%s4684_s6 + $0x40] sm:$0xff]  }
  0xa7   : > { %3911 = vrsqrt.f32 %v408_v22  ;;  %v3808_v22 = vld [vmem:[%s4684_s6 + $0x48] sm:$0xff]  }
  0xb1   : > { %v3912_v23 = vpop.eup %3911 }
  0xb2   : > { %v410_v25 = vmul.f32 %v3912_v23, %v4040_v8  ;;  %v3809_v23 = vld [vmem:[%s4684_s6 + $0x50] sm:$0xff]  }
  0xb4   : > { %v418_v26 = vmul.f32 %v2973_v24, %v410_v25  ;;  %v3810_v24 = vld [vmem:[%s4684_s6 + $0x58] sm:$0xff]   ;;  %v3811_v25 = vld [vmem:[%s4684_s6 + $0x60] sm:$0xff]  }
  0xb6   : > { %v4099_v28 = vpack.c.bf16 %v418_v26, %v418_v26  ;;  %v3812_v26 = vld [vmem:[%s4684_s6 + $0x68] sm:$0xff]  }
  0xb8   : > { %3461 = vmatmul.mubr.bf16.vlgmr.msra.gmra.mrb[0].mxu0 %v4099_v28  ;;  %3481 = vmatmul.mubr.bf16.vlgmr.msra.gmra.mrb[0].mxu1 %v4099_v28 }
  0xb9   : > { %3485 = vmatpush3.bf16.msra.mxu0 %v3783_v27  ;;  %3500 = vmatprep.mubr.msk.bf16.mxu0 %vm3940_vm0, %v3939_v0  ;;  %v3813_v27 = vld [vmem:[%s4684_s6 + $0x70] sm:$0xff]  }
  0xba   : > { %3486 = vmatprep.subr.bf16.mxu0 %v3939_v0  ;;  %3506 = vmatprep.mubr.msk.f32.mxu1 %vm3940_vm0, %v3939_v0 }
  0xbd   : > { %3487 = vmatpush3.bf16.msra.mxu0 %v3784_v29  ;;  %v3814_v29 = vld [vmem:[%s4684_s6 + $0x78] sm:$0xff]  }
  0xbe   : > { %3488 = vmatprep.subr.bf16.mxu0 %v3939_v0 }
  0xc1   : > { %3489 = vmatpush3.bf16.msra.mxu0 %v3785_v30  ;;  %v3815_v30 = vld [vmem:[%s4685_s7] sm:$0xff]  }
  0xc2   : > { %3490 = vmatprep.subr.bf16.mxu0 %v3939_v0 }
  0xc5   : > { %3491 = vmatpush3.bf16.msra.mxu0 %v3786_v31  ;;  %v3816_v31 = vld [vmem:[%s4685_s7 + $0x8] sm:$0xff]  }
  0xc6   : > { %3492 = vmatprep.subr.bf16.mxu0 %v3939_v0 }
  0xc9   : > { %3493 = vmatpush3.bf16.msra.mxu0 %v3787_v32 }
  0xca   : > { %3494 = vmatprep.subr.bf16.mxu0 %v3939_v0 }
  0xcd   : > { %3495 = vmatpush3.bf16.msra.mxu0 %v3788_v33  ;;  %v3817_v33 = vld [vmem:[%s4683_s5 + $0x80] sm:$0xff]  }
  0xce   : > { %3496 = vmatprep.subr.bf16.mxu0 %v3939_v0 }
  0xd1   : > { %3497 = vmatpush3.bf16.msra.mxu0 %v3789_v34 }
  0xd2   : > { %3498 = vmatprep.subr.bf16.mxu0 %v3939_v0 }
  0xd5   : > { %3499 = vmatpush3.bf16.msra.mxu0 %v3790_v35 }
  0xd6   : > { %3534 = vmatprep.subr.bf16.mxu0 %v3939_v0 }
  0xd8   : > { %3501 = vmatmul.mubr.bf16.vlgmr.msra.gmra.mrb[4].mxu0 %v4099_v28 }
  0xd9   : > { %3535 = vmatpush3.bf16.msra.mxu0 %v3791_v36  ;;  %3550 = vmatprep.mubr.msk.bf16.mxu0 %vm3940_vm0, %v3939_v0  ;;  %v3818_v36 = vld [vmem:[%s4683_s5 + $0x88] sm:$0xff]  }
  0xda   : > { %3536 = vmatprep.subr.bf16.mxu0 %v3939_v0 }
  0xdd   : > { %3537 = vmatpush3.bf16.msra.mxu0 %v3792_v37  ;;  %v3819_v37 = vld [vmem:[%s4683_s5 + $0x90] sm:$0xff]  }
  0xde   : > { %3538 = vmatprep.subr.bf16.mxu0 %v3939_v0 }
  0xe1   : > { %3539 = vmatpush3.bf16.msra.mxu0 %v3793_v38  ;;  %v3820_v38 = vld [vmem:[%s4683_s5 + $0x98] sm:$0xff]  }
  0xe2   : > { %3540 = vmatprep.subr.bf16.mxu0 %v3939_v0 }
  0xe5   : > { %3541 = vmatpush3.bf16.msra.mxu0 %v3794_v39  ;;  %v3821_v39 = vld [vmem:[%s4683_s5 + $0xa0] sm:$0xff]  }
  0xe6   : > { %3542 = vmatprep.subr.bf16.mxu0 %v3939_v0 }
  0xe9   : > { %3543 = vmatpush3.bf16.msra.mxu0 %v3795_v40  ;;  %v3822_v40 = vld [vmem:[%s4683_s5 + $0xa8] sm:$0xff]  }
  0xea   : > { %3544 = vmatprep.subr.bf16.mxu0 %v3939_v0 }
  0xed   : > { %3545 = vmatpush3.bf16.msra.mxu0 %v3796_v41  ;;  %v3823_v41 = vld [vmem:[%s4683_s5 + $0xb0] sm:$0xff]  }
  0xee   : > { %3546 = vmatprep.subr.bf16.mxu0 %v3939_v0 }
  0xf1   : > { %3547 = vmatpush3.bf16.msra.mxu0 %v3797_v42  ;;  %v3824_v42 = vld [vmem:[%s4683_s5 + $0xb8] sm:$0xff]  }
  0xf2   : > { %3548 = vmatprep.subr.bf16.mxu0 %v3939_v0 }
  0xf5   : > { %3549 = vmatpush3.bf16.msra.mxu0 %v3798_v43 }
  0xf6   : > { %3574 = vmatprep.subr.mxu0 %v3939_v0 }
  0xf8   : > { %3551 = vmatmul.mubr.bf16.vlgmr.msra.gmra.mrb[8].mxu0 %v4099_v28 }
  0xf9   : > { %3576 = vmatprep.mubr.msk.f32.mxu0 %vm3940_vm0, %v3939_v0 }
 0x18b   : > { %v529_v44 = vpop.f32.mrb[0].mxu0  ;;  %v633_v45 = vpop.f32.mrb[0].mxu1 }
 0x18c   : > { %v3462_v46 = vpop.f32.mrb[1].mxu0  ;;  %v3482_v47 = vpop.f32.mrb[1].mxu1  ;;  %3505 = vmatpush3.xpose.msk.msra.mxu1 %vm743_vm1, %v633_v45 }
 0x18d   : > { %v532_v48 = vpop.f32.mrb[2].mxu0  ;;  %v636_v49 = vpop.f32.mrb[2].mxu1  ;;  %3509 = vmatprep.subr.mxu1 %v3939_v0 }
 0x18e   : > { %v3463_v50 = vpop.f32.mrb[3].mxu0  ;;  %v3483_v51 = vpop.f32.mrb[3].mxu1 }
 0x18f   : > { %3507 = vmatmul.mubr.msk.f32.vlgmr.msra.gmra.mrb[4].mxu1 %vm743_vm1, %v529_v44 }
 0x190   : > { %3511 = vmatprep.mubr.msk.f32.mxu1 %vm3940_vm0, %v3939_v0 }
 0x1ab   : > { %v737_v52 = vpop.f32.mrb[4].mxu0 }
 0x1ac   : > { %v3502_v53 = vpop.f32.mrb[5].mxu0  ;;  %3510 = vmatpush3.msra.mxu1 %v737_v52 }
 0x1ad   : > { %v740_v54 = vpop.f32.mrb[6].mxu0  ;;  %3514 = vmatprep.subr.bf16.mxu1 %v3939_v0 }
 0x1ae   : > { %v3503_v55 = vpop.f32.mrb[7].mxu0 }
 0x1af   : > { %v398_v55 = vld [vmem:[%s4679_s1 + $0x8] sm:$0xff] }
 0x1cb   : > { %v1114_v56 = vpop.f32.mrb[8].mxu0 }
 0x1cc   : > { %v3552_v57 = vpop.f32.mrb[9].mxu0  ;;  %3575 = vmatpush3.xpose.msk.msra.mxu0 %vm743_vm1, %v1114_v56  ;;  %v428_v56 = vadd.f32 %v4189_v61, %v398_v55 }
 0x1cd   : > { %v1117_v58 = vpop.f32.mrb[10].mxu0  ;;  %3579 = vmatprep.subr.mxu0 %v3939_v0 }
 0x1ce   : > { %v3553_v59 = vpop.f32.mrb[11].mxu0 }
 0x262   : > { %v816_v63 = vpop.f32.mrb[4].mxu1 }
 0x263   : > { %v817_v1 = vadd.f32 %v816_v63, %v427_v62  ;;  %v3508_v2 = vpop.f32.mrb[5].mxu1 }
 0x265   : > { %v821_v3 = vsel %vm820_vm2, %v817_v1, -inf }
 0x266   : > { %822 = vmax.xlane.f32.xlu0 %v821_v3 }
 0x2f3   : > { %v823_v4 = vpop.xlane.xlu0 %822 }
 0x2f4   : > { %v824_v5 = vsub.f32 %v817_v1, %v823_v4 }
 0x2f6   : > { %v825_v6 = vmul.f32 1.442695, %v824_v5 }
 0x2f8   : > { %3913 = vpow2.f32 %v825_v6 }
 0x302   : > { %v3914_v7 = vpop.eup %3913 }
 0x303   : > { %v827_v9 = vsel %vm820_vm2, %v3914_v7, 0.0 }
 0x304   : > { %828 = vadd.xlane.f32.xlu1 %v827_v9 }
 0x391   : > { %v829_v10 = vpop.xlane.xlu1 %828 }
 0x392   : > { %3915 = vrcp.f32 %v829_v10 }
 0x39c   : > { %v3916_v11 = vpop.eup %3915 }
 0x39d   : > { %v831_v13 = vmul.f32 %v3916_v11, %v3914_v7  ;;  %v3825_v11 = vld [vmem:[%s4685_s7 + $0x10] sm:$0xff]  }
 0x39f   : > { %3512 = vmatmul.mubr.msk.f32.vlgmr.msra.gmra.mrb[6].mxu1 %vm820_vm2, %v831_v13  ;;  %v3826_v13 = vld [vmem:[%s4685_s7 + $0x18] sm:$0xff]  }
 0x3a0   : > { %3515 = vmatpush3.bf16.msra.mxu1 %v3799_v12  ;;  %3530 = vmatprep.mubr.msk.bf16.mxu1 %vm3940_vm0, %v3939_v0 }
 0x3a1   : > { %3516 = vmatprep.subr.bf16.mxu1 %v3939_v0 }
 0x3a4   : > { %3517 = vmatpush3.bf16.msra.mxu1 %v3800_v14 }
 0x3a5   : > { %3518 = vmatprep.subr.bf16.mxu1 %v3939_v0 }
 0x3a8   : > { %3519 = vmatpush3.bf16.msra.mxu1 %v3801_v15  ;;  %v3827_v15 = vld [vmem:[%s4682_s4 + $0x80] sm:$0xff]  }
 0x3a9   : > { %3520 = vmatprep.subr.bf16.mxu1 %v3939_v0 }
 0x3ac   : > { %3521 = vmatpush3.bf16.msra.mxu1 %v3802_v16 }
 0x3ad   : > { %3522 = vmatprep.subr.bf16.mxu1 %v3939_v0 }
 0x3b0   : > { %3523 = vmatpush3.bf16.msra.mxu1 %v3803_v17 }
 0x3b1   : > { %3524 = vmatprep.subr.bf16.mxu1 %v3939_v0 }
 0x3b4   : > { %3525 = vmatpush3.bf16.msra.mxu1 %v3804_v18  ;;  %v3828_v18 = vld [vmem:[%s4682_s4 + $0x88] sm:$0xff]  }
 0x3b5   : > { %3526 = vmatprep.subr.bf16.mxu1 %v3939_v0 }
 0x3b8   : > { %3527 = vmatpush3.bf16.msra.mxu1 %v3805_v19  ;;  %v3829_v19 = vld [vmem:[%s4682_s4 + $0x90] sm:$0xff]  }
 0x3b9   : > { %3528 = vmatprep.subr.bf16.mxu1 %v3939_v0 }
 0x3bc   : > { %3529 = vmatpush3.bf16.msra.mxu1 %v3806_v20  ;;  %v3830_v20 = vld [vmem:[%s4682_s4 + $0x98] sm:$0xff]  }
 0x3bd   : > { %3554 = vmatprep.subr.bf16.mxu1 %v3939_v0 }
 0x3bf   : > { %3531 = vmatmul.mubr.bf16.vlgmr.msra.gmra.mrb[8].mxu1 %v4099_v28 }
 0x3c0   : > { %3555 = vmatpush3.bf16.msra.mxu1 %v3807_v21  ;;  %3570 = vmatprep.mubr.msk.bf16.mxu1 %vm3940_vm0, %v3939_v0  ;;  %v3831_v21 = vld [vmem:[%s4682_s4 + $0xa0] sm:$0xff]  }
 0x3c1   : > { %3556 = vmatprep.subr.bf16.mxu1 %v3939_v0 }
 0x3c4   : > { %3557 = vmatpush3.bf16.msra.mxu1 %v3808_v22  ;;  %v3832_v22 = vld [vmem:[%s4682_s4 + $0xa8] sm:$0xff]  }
 0x3c5   : > { %3558 = vmatprep.subr.bf16.mxu1 %v3939_v0 }
 0x3c8   : > { %3559 = vmatpush3.bf16.msra.mxu1 %v3809_v23  ;;  %v3833_v23 = vld [vmem:[%s4682_s4 + $0xb0] sm:$0xff]  }
 0x3c9   : > { %3560 = vmatprep.subr.bf16.mxu1 %v3939_v0 }
 0x3cc   : > { %3561 = vmatpush3.bf16.msra.mxu1 %v3810_v24  ;;  %v3834_v24 = vld [vmem:[%s4682_s4 + $0xb8] sm:$0xff]  }
 0x3cd   : > { %3562 = vmatprep.subr.bf16.mxu1 %v3939_v0 }
 0x3d0   : > { %3563 = vmatpush3.bf16.msra.mxu1 %v3811_v25  ;;  %v3835_v25 = vld [vmem:[%s4684_s6 + $0x80] sm:$0xff]  }
 0x3d1   : > { %3564 = vmatprep.subr.bf16.mxu1 %v3939_v0 }
 0x3d4   : > { %3565 = vmatpush3.bf16.msra.mxu1 %v3812_v26  ;;  %v3836_v26 = vld [vmem:[%s4684_s6 + $0x88] sm:$0xff]  }
 0x3d5   : > { %3566 = vmatprep.subr.bf16.mxu1 %v3939_v0 }
 0x3d8   : > { %3567 = vmatpush3.bf16.msra.mxu1 %v3813_v27  ;;  %v3837_v27 = vld [vmem:[%s4684_s6 + $0x90] sm:$0xff]  }
 0x3d9   : > { %3568 = vmatprep.subr.bf16.mxu1 %v3939_v0 }
 0x3dc   : > { %3569 = vmatpush3.bf16.msra.mxu1 %v3814_v29  ;;  %v3838_v29 = vld [vmem:[%s4684_s6 + $0x98] sm:$0xff]  }
 0x3dd   : > { %3592 = vmatprep.subr.bf16.mxu1 %v3939_v0 }
 0x3df   : > { %3571 = vmatmul.mubr.bf16.vlgmr.msra.gmra.mrb[12].mxu1 %v4099_v28 }
 0x3e0   : > { %3593 = vmatpush3.bf16.msra.mxu1 %v3815_v30  ;;  %3596 = vmatprep.mubr.msk.bf16.mxu1 %vm3940_vm0, %v3939_v0  ;;  %v3839_v30 = vld [vmem:[%s4684_s6 + $0xa0] sm:$0xff]  }
 0x3e1   : > { %3594 = vmatprep.subr.bf16.mxu1 %v3939_v0 }
 0x3e4   : > { %3595 = vmatpush3.bf16.msra.mxu1 %v3816_v31  ;;  %v3840_v31 = vld [vmem:[%s4684_s6 + $0xa8] sm:$0xff]  }
 0x3e5   : > { %3620 = vmatprep.subr.bf16.mxu1 %v3939_v0 }
 0x472   : > { %v901_v32 = vpop.f32.mrb[6].mxu1 }
 0x473   : > { %v905_v34 = vpack.c.bf16 %v901_v32, %v901_v32  ;;  %v3513_v35 = vpop.f32.mrb[7].mxu1  ;;  %v3841_v32 = vld [vmem:[%s4684_s6 + $0xb0] sm:$0xff]  }
 0x474   : > { %v3844_v35 = vld [vmem:[%s4683_s5 + $0xc8] sm:$0xff]  }
 0x475   : > { %3597 = vmatmul.mubr.msk.bf16.vlgmr.msra.gmra.mrb[16].mxu1 %vm743_vm1, %v905_v34  ;;  %v3843_v34 = vld [vmem:[%s4683_s5 + $0xc0] sm:$0xff]  }
 0x476   : > { %3621 = vmatpush3.bf16.msra.mxu1 %v3817_v33  ;;  %3636 = vmatprep.mubr.msk.bf16.mxu1 %vm3940_vm0, %v3939_v0  ;;  %v3842_v33 = vld [vmem:[%s4684_s6 + $0xb8] sm:$0xff]  }
 0x477   : > { %3622 = vmatprep.subr.bf16.mxu1 %v3939_v0 }
 0x47a   : > { %3623 = vmatpush3.bf16.msra.mxu1 %v3818_v36  ;;  %v3845_v36 = vld [vmem:[%s4683_s5 + $0xd0] sm:$0xff]  }
 0x47b   : > { %3624 = vmatprep.subr.bf16.mxu1 %v3939_v0 }
 0x47e   : > { %3625 = vmatpush3.bf16.msra.mxu1 %v3819_v37  ;;  %v3846_v37 = vld [vmem:[%s4683_s5 + $0xd8] sm:$0xff]  }
 0x47f   : > { %3626 = vmatprep.subr.bf16.mxu1 %v3939_v0 }
 0x482   : > { %3627 = vmatpush3.bf16.msra.mxu1 %v3820_v38  ;;  %v3847_v38 = vld [vmem:[%s4683_s5 + $0xe0] sm:$0xff]  }
 0x483   : > { %3628 = vmatprep.subr.bf16.mxu1 %v3939_v0 }
 0x486   : > { %3629 = vmatpush3.bf16.msra.mxu1 %v3821_v39  ;;  %v3848_v39 = vld [vmem:[%s4683_s5 + $0xe8] sm:$0xff]  }
 0x487   : > { %3630 = vmatprep.subr.bf16.mxu1 %v3939_v0 }
 0x48a   : > { %3631 = vmatpush3.bf16.msra.mxu1 %v3822_v40  ;;  %v3849_v40 = vld [vmem:[%s4683_s5 + $0xf0] sm:$0xff]  }
 0x48b   : > { %3632 = vmatprep.subr.bf16.mxu1 %v3939_v0 }
 0x48e   : > { %3633 = vmatpush3.bf16.msra.mxu1 %v3823_v41  ;;  %v3850_v41 = vld [vmem:[%s4683_s5 + $0xf8] sm:$0xff]  }
 0x48f   : > { %3634 = vmatprep.subr.bf16.mxu1 %v3939_v0 }
 0x492   : > { %v1009_v43 = vpop.f32.mrb[8].mxu1  ;;  %3635 = vmatpush3.bf16.msra.mxu1 %v3824_v42 }
 0x493   : > { %v3532_v44 = vpop.f32.mrb[9].mxu1  ;;  %3577 = vmatmul.mubr.msk.f32.vlgmr.msra.gmra.mrb[12].mxu0 %vm743_vm1, %v1009_v43  ;;  %3660 = vmatprep.subr.mxu1 %v3939_v0 }
 0x494   : > { %v1012_v45 = vpop.f32.mrb[10].mxu1  ;;  %3581 = vmatprep.mubr.msk.f32.mxu0 %vm3940_vm0, %v3939_v0 }
 0x495   : > { %v3533_v46 = vpop.f32.mrb[11].mxu1  ;;  %3637 = vmatmul.mubr.bf16.vlgmr.msra.gmra.mrb[20].mxu1 %v4099_v28 }
 0x496   : > { %3662 = vmatprep.mubr.msk.f32.mxu1 %vm3940_vm0, %v3939_v0 }
 0x4b2   : > { %v1219_v47 = vpop.f32.mrb[12].mxu1 }
 0x4b3   : > { %v3572_v48 = vpop.f32.mrb[13].mxu1  ;;  %3580 = vmatpush3.msra.mxu0 %v1219_v47 }
 0x4b4   : > { %v1222_v49 = vpop.f32.mrb[14].mxu1  ;;  %3584 = vmatprep.subr.bf16.mxu0 %v3939_v0 }
 0x4b5   : > { %v3573_v50 = vpop.f32.mrb[15].mxu1 }
 0x548   : > { %v4317_v51 = vpop.f32.mrb[16].mxu1 }
 0x549   : > { %v3598_v52 = vpop.f32.mrb[17].mxu1 }
 0x54a   : > { %v1498_v53 = vpop.f32.mrb[18].mxu1 }
 0x54b   : > { %v3599_v54 = vpop.f32.mrb[19].mxu1 }
 0x566   : > { %v1297_v57 = vpop.f32.mrb[12].mxu0 }
 0x567   : > { %v1298_v58 = vadd.f32 %v1297_v57, %v428_v56  ;;  %v3578_v59 = vpop.f32.mrb[13].mxu0 }
 0x568   : > { %v1705_v60 = vpop.f32.mrb[20].mxu1  ;;  %v399_v59 = vld [vmem:[%s4679_s1 + $0x10] sm:$0xff] }
 0x569   : > { %v3638_v62 = vpop.f32.mrb[21].mxu1  ;;  %3661 = vmatpush3.xpose.msk.msra.mxu1 %vm743_vm1, %v1705_v60  ;;  %v1301_v63 = vsel %vm820_vm2, %v1298_v58, -inf  ;;  %v429_v60 = vadd.f32 %v4189_v61, %v399_v59 }
 0x56a   : > { %v1708_v1 = vpop.f32.mrb[22].mxu1  ;;  %1302 = vmax.xlane.f32.xlu1 %v1301_v63  ;;  %3665 = vmatprep.subr.mxu1 %v3939_v0 }
 0x56b   : > { %v3639_v2 = vpop.f32.mrb[23].mxu1 }
 0x5f7   : > { %v1303_v3 = vpop.xlane.xlu1 %1302 }
 0x5f8   : > { %v1304_v4 = vsub.f32 %v1298_v58, %v1303_v3 }
 0x5fa   : > { %v1305_v5 = vmul.f32 1.442695, %v1304_v4 }
 0x5fc   : > { %3917 = vpow2.f32 %v1305_v5 }
 0x606   : > { %v3918_v6 = vpop.eup %3917 }
 0x607   : > { %v1307_v7 = vsel %vm820_vm2, %v3918_v6, 0.0 }
 0x608   : > { %1308 = vadd.xlane.f32.xlu0 %v1307_v7 }
 0x695   : > { %v1309_v9 = vpop.xlane.xlu0 %1308 }
 0x696   : > { %3919 = vrcp.f32 %v1309_v9 }
 0x6a0   : > { %v3920_v10 = vpop.eup %3919 }
 0x6a1   : > { %v1311_v12 = vmul.f32 %v3920_v10, %v3918_v6 }
 0x6a3   : > { %3582 = vmatmul.mubr.msk.f32.vlgmr.msra.gmra.mrb[14].mxu0 %vm820_vm2, %v1311_v12 }
 0x6a4   : > { %3585 = vmatpush3.bf16.msra.mxu0 %v3825_v11  ;;  %3588 = vmatprep.mubr.msk.bf16.mxu0 %vm3940_vm0, %v3939_v0  ;;  %v3851_v11 = vld [vmem:[%s4685_s7 + $0x20] sm:$0xff]  }
 0x6a5   : > { %3586 = vmatprep.subr.bf16.mxu0 %v3939_v0 }
 0x6a8   : > { %3587 = vmatpush3.bf16.msra.mxu0 %v3826_v13  ;;  %v3852_v13 = vld [vmem:[%s4685_s7 + $0x28] sm:$0xff]  }
 0x6a9   : > { %3600 = vmatprep.subr.bf16.mxu0 %v3939_v0 }
 0x776   : > { %v1381_v14 = vpop.f32.mrb[14].mxu0 }
 0x777   : > { %v1385_v16 = vpack.c.bf16 %v1381_v14, %v1381_v14  ;;  %v3583_v17 = vpop.f32.mrb[15].mxu0 }
 0x779   : > { %3589 = vmatmul.mubr.msk.bf16.vlgmr.msra.gmra.mrb[16].mxu0 %vm743_vm1, %v1385_v16 }
 0x77a   : > { %3601 = vmatpush3.bf16.msra.mxu0 %v3827_v15  ;;  %3616 = vmatprep.mubr.msk.bf16.mxu0 %vm3940_vm0, %v3939_v0  ;;  %v3853_v15 = vld [vmem:[%s4682_s4 + $0xc0] sm:$0xff]  }
 0x77b   : > { %3602 = vmatprep.subr.bf16.mxu0 %v3939_v0 }
 0x77e   : > { %3603 = vmatpush3.bf16.msra.mxu0 %v3828_v18  ;;  %v3854_v18 = vld [vmem:[%s4682_s4 + $0xc8] sm:$0xff]  }
 0x77f   : > { %3604 = vmatprep.subr.bf16.mxu0 %v3939_v0 }
 0x782   : > { %3605 = vmatpush3.bf16.msra.mxu0 %v3829_v19  ;;  %v3855_v19 = vld [vmem:[%s4682_s4 + $0xd0] sm:$0xff]  }
 0x783   : > { %3606 = vmatprep.subr.bf16.mxu0 %v3939_v0 }
 0x786   : > { %3607 = vmatpush3.bf16.msra.mxu0 %v3830_v20  ;;  %v3856_v20 = vld [vmem:[%s4682_s4 + $0xd8] sm:$0xff]  }
 0x787   : > { %3608 = vmatprep.subr.bf16.mxu0 %v3939_v0 }
 0x78a   : > { %3609 = vmatpush3.bf16.msra.mxu0 %v3831_v21  ;;  %v3857_v21 = vld [vmem:[%s4682_s4 + $0xe0] sm:$0xff]  }
 0x78b   : > { %3610 = vmatprep.subr.bf16.mxu0 %v3939_v0 }
 0x78e   : > { %3611 = vmatpush3.bf16.msra.mxu0 %v3832_v22  ;;  %v3858_v22 = vld [vmem:[%s4682_s4 + $0xe8] sm:$0xff]  }
 0x78f   : > { %3612 = vmatprep.subr.bf16.mxu0 %v3939_v0 }
 0x792   : > { %3613 = vmatpush3.bf16.msra.mxu0 %v3833_v23  ;;  %v3859_v23 = vld [vmem:[%s4682_s4 + $0xf0] sm:$0xff]  }
 0x793   : > { %3614 = vmatprep.subr.bf16.mxu0 %v3939_v0 }
 0x796   : > { %3615 = vmatpush3.bf16.msra.mxu0 %v3834_v24  ;;  %v3860_v24 = vld [vmem:[%s4682_s4 + $0xf8] sm:$0xff]  }
 0x797   : > { %3640 = vmatprep.subr.bf16.mxu0 %v3939_v0 }
 0x799   : > { %3617 = vmatmul.mubr.bf16.vlgmr.msra.gmra.mrb[20].mxu0 %v4099_v28 }
 0x79a   : > { %3641 = vmatpush3.bf16.msra.mxu0 %v3835_v25  ;;  %3656 = vmatprep.mubr.msk.bf16.mxu0 %vm3940_vm0, %v3939_v0  ;;  %v3861_v25 = vld [vmem:[%s4684_s6 + $0xc0] sm:$0xff]  }
 0x79b   : > { %3642 = vmatprep.subr.bf16.mxu0 %v3939_v0 }
 0x79e   : > { %3643 = vmatpush3.bf16.msra.mxu0 %v3836_v26  ;;  %v3862_v26 = vld [vmem:[%s4684_s6 + $0xc8] sm:$0xff]  }
 0x79f   : > { %3644 = vmatprep.subr.bf16.mxu0 %v3939_v0 }
 0x7a2   : > { %3645 = vmatpush3.bf16.msra.mxu0 %v3837_v27  ;;  %v3863_v27 = vld [vmem:[%s4684_s6 + $0xd0] sm:$0xff]  }
 0x7a3   : > { %3646 = vmatprep.subr.bf16.mxu0 %v3939_v0 }
 0x7a6   : > { %3647 = vmatpush3.bf16.msra.mxu0 %v3838_v29  ;;  %v3864_v29 = vld [vmem:[%s4684_s6 + $0xd8] sm:$0xff]  }
 0x7a7   : > { %3648 = vmatprep.subr.bf16.mxu0 %v3939_v0 }
 0x7aa   : > { %3649 = vmatpush3.bf16.msra.mxu0 %v3839_v30  ;;  %v3865_v30 = vld [vmem:[%s4684_s6 + $0xe0] sm:$0xff]  }
 0x7ab   : > { %3650 = vmatprep.subr.bf16.mxu0 %v3939_v0 }
 0x7ae   : > { %3651 = vmatpush3.bf16.msra.mxu0 %v3840_v31  ;;  %v3866_v31 = vld [vmem:[%s4684_s6 + $0xe8] sm:$0xff]  }
 0x7af   : > { %3652 = vmatprep.subr.bf16.mxu0 %v3939_v0 }
 0x7b2   : > { %3653 = vmatpush3.bf16.msra.mxu0 %v3841_v32  ;;  %v3867_v32 = vld [vmem:[%s4684_s6 + $0xf0] sm:$0xff]  }
 0x7b3   : > { %3654 = vmatprep.subr.bf16.mxu0 %v3939_v0 }
 0x7b6   : > { %3655 = vmatpush3.bf16.msra.mxu0 %v3842_v33  ;;  %v3868_v33 = vld [vmem:[%s4684_s6 + $0xf8] sm:$0xff]  }
 0x7b7   : > { %3698 = vmatprep.subr.bf16.mxu0 %v3939_v0 }
 0x7b9   : > { %3657 = vmatmul.mubr.bf16.vlgmr.msra.gmra.mrb[24].mxu0 %v4099_v28 }
 0x7ba   : > { %3699 = vmatpush3.bf16.msra.mxu0 %v3843_v34  ;;  %3714 = vmatprep.mubr.msk.bf16.mxu0 %vm3940_vm0, %v3939_v0 }
 0x7bb   : > { %3700 = vmatprep.subr.bf16.mxu0 %v3939_v0 }
 0x7be   : > { %3701 = vmatpush3.bf16.msra.mxu0 %v3844_v35 }
 0x7bf   : > { %3702 = vmatprep.subr.bf16.mxu0 %v3939_v0 }
 0x7c2   : > { %3703 = vmatpush3.bf16.msra.mxu0 %v3845_v36 }
 0x7c3   : > { %3704 = vmatprep.subr.bf16.mxu0 %v3939_v0 }
 0x7c6   : > { %3705 = vmatpush3.bf16.msra.mxu0 %v3846_v37 }
 0x7c7   : > { %3706 = vmatprep.subr.bf16.mxu0 %v3939_v0 }
 0x7ca   : > { %3707 = vmatpush3.bf16.msra.mxu0 %v3847_v38 }
 0x7cb   : > { %3708 = vmatprep.subr.bf16.mxu0 %v3939_v0 }
 0x7ce   : > { %3709 = vmatpush3.bf16.msra.mxu0 %v3848_v39 }
 0x7cf   : > { %3710 = vmatprep.subr.bf16.mxu0 %v3939_v0 }
 0x7d2   : > { %3711 = vmatpush3.bf16.msra.mxu0 %v3849_v40 }
 0x7d3   : > { %3712 = vmatprep.subr.bf16.mxu0 %v3939_v0 }
 0x7d6   : > { %3713 = vmatpush3.bf16.msra.mxu0 %v3850_v41 }
 0x7d7   : > { %3738 = vmatprep.subr.mxu0 %v3939_v0 }
 0x7d9   : > { %3715 = vmatmul.mubr.bf16.vlgmr.msra.gmra.mrb[28].mxu0 %v4099_v28 }
 0x7da   : > { %3740 = vmatprep.mubr.msk.f32.mxu0 %vm3940_vm0, %v3939_v0 }
 0x84c   : > { %v1440_v42 = vpop.f32.mrb[16].mxu0 }
 0x84d   : > { %v4447_v43 = vadd.f32 %v4317_v51, %v1440_v42  ;;  %v3590_v44 = vpop.f32.mrb[17].mxu0 }
 0x84e   : > { %v1443_v45 = vpop.f32.mrb[18].mxu0 }
 0x84f   : > { %v3591_v46 = vpop.f32.mrb[19].mxu0 }
 0x86c   : > { %v1600_v47 = vpop.f32.mrb[20].mxu0 }
 0x86d   : > { %v3618_v48 = vpop.f32.mrb[21].mxu0  ;;  %3663 = vmatmul.mubr.msk.f32.vlgmr.msra.gmra.mrb[24].mxu1 %vm743_vm1, %v1600_v47 }
 0x86e   : > { %v1603_v49 = vpop.f32.mrb[22].mxu0  ;;  %3667 = vmatprep.mubr.msk.f32.mxu1 %vm3940_vm0, %v3939_v0 }
 0x86f   : > { %v3619_v50 = vpop.f32.mrb[23].mxu0 }
 0x88c   : > { %v1810_v52 = vpop.f32.mrb[24].mxu0 }
 0x88d   : > { %v3658_v53 = vpop.f32.mrb[25].mxu0  ;;  %3666 = vmatpush3.msra.mxu1 %v1810_v52 }
 0x88e   : > { %v1813_v54 = vpop.f32.mrb[26].mxu0  ;;  %3670 = vmatprep.subr.bf16.mxu1 %v3939_v0 }
 0x88f   : > { %v3659_v51 = vpop.f32.mrb[27].mxu0 }
 0x8ac   : > { %v2242_v55 = vpop.f32.mrb[28].mxu0 }
 0x8ad   : > { %v3716_v56 = vpop.f32.mrb[29].mxu0  ;;  %3739 = vmatpush3.xpose.msk.msra.mxu0 %vm743_vm1, %v2242_v55 }
 0x8ae   : > { %v2245_v57 = vpop.f32.mrb[30].mxu0  ;;  %3743 = vmatprep.subr.mxu0 %v3939_v0 }
 0x8af   : > { %v3717_v58 = vpop.f32.mrb[31].mxu0 }
 0x940   : > { %v1888_v62 = vpop.f32.mrb[24].mxu1 }
 0x941   : > { %v1889_v63 = vadd.f32 %v1888_v62, %v429_v60  ;;  %v3664_v1 = vpop.f32.mrb[25].mxu1  ;;  %v3870_v60 = vld [vmem:[%s4685_s7 + $0x38] sm:$0xff]  }
 0x943   : > { %v1892_v2 = vsel %vm820_vm2, %v1889_v63, -inf }
 0x944   : > { %1893 = vmax.xlane.f32.xlu1 %v1892_v2  ;;  %v3871_v2 = vld [vmem:[%s4687_s9] ss:$8 sps:$4 sm:$0xff]  }
 0x9d1   : > { %v1894_v3 = vpop.xlane.xlu1 %1893 }
 0x9d2   : > { %v1895_v4 = vsub.f32 %v1889_v63, %v1894_v3  ;;  %v3873_v3 = vld [vmem:[%s4687_s9 + $0x4] ss:$8 sps:$4 sm:$0xff]  }
 0x9d4   : > { %v1896_v5 = vmul.f32 1.442695, %v1895_v4  ;;  %v3874_v4 = vld [vmem:[%s4687_s9 + $0x10] ss:$8 sps:$4 sm:$0xff]  }
 0x9d6   : > { %3921 = vpow2.f32 %v1896_v5  ;;  %v3879_v5 = vld [vmem:[%s4687_s9 + $0x24] ss:$8 sps:$4 sm:$0xff]  }
 0x9e0   : > { %v3922_v6 = vpop.eup %3921 }
 0x9e1   : > { %v1898_v7 = vsel %vm820_vm2, %v3922_v6, 0.0 }
 0x9e2   : > { %1899 = vadd.xlane.f32.xlu0 %v1898_v7 }
 0xa6f   : > { %v1900_v9 = vpop.xlane.xlu0 %1899 }
 0xa70   : > { %3923 = vrcp.f32 %v1900_v9 }
 0xa7a   : > { %v3924_v10 = vpop.eup %3923 }
 0xa7b   : > { %v1902_v12 = vmul.f32 %v3924_v10, %v3922_v6  ;;  %v3877_v6 = vld [vmem:[%s4687_s9 + $0x20] ss:$8 sps:$4 sm:$0xff]  }
 0xa7d   : > { %3668 = vmatmul.mubr.msk.f32.vlgmr.msra.gmra.mrb[26].mxu1 %vm820_vm2, %v1902_v12 }
 0xa7e   : > { %3671 = vmatpush3.bf16.msra.mxu1 %v3851_v11  ;;  %3674 = vmatprep.mubr.msk.bf16.mxu1 %vm3940_vm0, %v3939_v0 }
 0xa7f   : > { %3672 = vmatprep.subr.bf16.mxu1 %v3939_v0 }
 0xa82   : > { %3673 = vmatpush3.bf16.msra.mxu1 %v3852_v13 }
 0xa83   : > { %3678 = vmatprep.subr.bf16.mxu1 %v3939_v0 }
 0xb50   : > { %v1972_v14 = vpop.f32.mrb[26].mxu1 }
 0xb51   : > { %v1976_v16 = vpack.c.bf16 %v1972_v14, %v1972_v14  ;;  %v3669_v17 = vpop.f32.mrb[27].mxu1 }
 0xb52   : > { %v3883_v17 = vld [vmem:[%s4687_s9 + $0x40] ss:$8 sps:$4 sm:$0xff]  }
 0xb53   : > { %3675 = vmatmul.mubr.msk.bf16.vlgmr.msra.gmra.mrb[28].mxu1 %vm743_vm1, %v1976_v16  ;;  %v3880_v16 = vld [vmem:[%s4687_s9 + $0x30] ss:$8 sps:$4 sm:$0xff]  }
 0xb54   : > { %3679 = vmatpush3.bf16.msra.mxu1 %v3853_v15  ;;  %3694 = vmatprep.mubr.msk.bf16.mxu1 %vm3940_vm0, %v3939_v0  ;;  %v3882_v15 = vld [vmem:[%s4687_s9 + $0x34] ss:$8 sps:$4 sm:$0xff]  }
 0xb55   : > { %3680 = vmatprep.subr.bf16.mxu1 %v3939_v0 }
 0xb58   : > { %3681 = vmatpush3.bf16.msra.mxu1 %v3854_v18  ;;  %v3888_v18 = vld [vmem:[%s4687_s9 + $0x54] ss:$8 sps:$4 sm:$0xff]  }
 0xb59   : > { %3682 = vmatprep.subr.bf16.mxu1 %v3939_v0 }
 0xb5c   : > { %3683 = vmatpush3.bf16.msra.mxu1 %v3855_v19  ;;  %v3886_v19 = vld [vmem:[%s4687_s9 + $0x50] ss:$8 sps:$4 sm:$0xff]  }
 0xb5d   : > { %3684 = vmatprep.subr.bf16.mxu1 %v3939_v0 }
 0xb60   : > { %3685 = vmatpush3.bf16.msra.mxu1 %v3856_v20  ;;  %v3891_v20 = vld [vmem:[%s4687_s9 + $0x64] ss:$8 sps:$4 sm:$0xff]  }
 0xb61   : > { %3686 = vmatprep.subr.bf16.mxu1 %v3939_v0 }
 0xb64   : > { %3687 = vmatpush3.bf16.msra.mxu1 %v3857_v21  ;;  %v3941_v21 = vmov 0  }
 0xb65   : > { %3688 = vmatprep.subr.bf16.mxu1 %v3939_v0 }
 0xb68   : > { %3689 = vmatpush3.bf16.msra.mxu1 %v3858_v22  ;;  %v3889_v22 = vld [vmem:[%s4687_s9 + $0x60] ss:$8 sps:$4 sm:$0xff]  }
 0xb69   : > { %3690 = vmatprep.subr.bf16.mxu1 %v3939_v0 }
 0xb6c   : > { %3691 = vmatpush3.bf16.msra.mxu1 %v3859_v23  ;;  %v3894_v23 = vld [vmem:[%s4687_s9 + $0x74] ss:$8 sps:$4 sm:$0xff]  }
 0xb6d   : > { %3692 = vmatprep.subr.bf16.mxu1 %v3939_v0 }
 0xb70   : > { %3693 = vmatpush3.bf16.msra.mxu1 %v3860_v24  ;;  %v3892_v24 = vld [vmem:[%s4687_s9 + $0x70] ss:$8 sps:$4 sm:$0xff]  }
 0xb71   : > { %3718 = vmatprep.subr.bf16.mxu1 %v3939_v0 }
 0xb73   : > { %3695 = vmatmul.mubr.bf16.vlgmr.msra.gmra.mrb[32].mxu1 %v4099_v28 }
 0xb74   : > { %3719 = vmatpush3.bf16.msra.mxu1 %v3861_v25  ;;  %3734 = vmatprep.mubr.msk.bf16.mxu1 %vm3940_vm0, %v3939_v0  ;;  %v3895_v25 = vld [vmem:[%s4688_s10 + $0x40] sm:$0xff]  }
 0xb75   : > { %3720 = vmatprep.subr.bf16.mxu1 %v3939_v0 }
 0xb78   : > { %3721 = vmatpush3.bf16.msra.mxu1 %v3862_v26  ;;  %v3896_v26 = vld [vmem:[%s4688_s10] sm:$0xff]  }
 0xb79   : > { %3722 = vmatprep.subr.bf16.mxu1 %v3939_v0 }
 0xb7c   : > { %3723 = vmatpush3.bf16.msra.mxu1 %v3863_v27  ;;  %v3897_v27 = vld [vmem:[%s4688_s10 + $0x48] sm:$0xff]  }
 0xb7d   : > { %3724 = vmatprep.subr.bf16.mxu1 %v3939_v0 }
 0xb80   : > { %3725 = vmatpush3.bf16.msra.mxu1 %v3864_v29  ;;  %v3898_v29 = vld [vmem:[%s4688_s10 + $0x8] sm:$0xff]  }
 0xb81   : > { %3726 = vmatprep.subr.bf16.mxu1 %v3939_v0 }
 0xb84   : > { %3727 = vmatpush3.bf16.msra.mxu1 %v3865_v30  ;;  %v3899_v30 = vld [vmem:[%s4688_s10 + $0x50] sm:$0xff]  }
 0xb85   : > { %3728 = vmatprep.subr.bf16.mxu1 %v3939_v0 }
 0xb88   : > { %3729 = vmatpush3.bf16.msra.mxu1 %v3866_v31  ;;  %v3900_v31 = vld [vmem:[%s4688_s10 + $0x10] sm:$0xff]  }
 0xb89   : > { %3730 = vmatprep.subr.bf16.mxu1 %v3939_v0 }
 0xb8c   : > { %3731 = vmatpush3.bf16.msra.mxu1 %v3867_v32  ;;  %v3901_v32 = vld [vmem:[%s4688_s10 + $0x58] sm:$0xff]  }
 0xb8d   : > { %3732 = vmatprep.subr.bf16.mxu1 %v3939_v0 }
 0xb90   : > { %3733 = vmatpush3.bf16.msra.mxu1 %v3868_v33  ;;  %v3902_v33 = vld [vmem:[%s4688_s10 + $0x18] sm:$0xff]  }
 0xb91   : > { %3422 = vmatprep.subr.bf16.mxu1 %v3895_v25 }
 0xb93   : > { %3735 = vmatmul.mubr.bf16.vlgmr.msra.gmra.mrb[36].mxu1 %v4099_v28 }
 0xb94   : > { %3423 = vmatpush3.bf16.msra.mxu1 %v3896_v26 }
 0xb95   : > { %3424 = vmatprep.subr.bf16.mxu1 %v3897_v27 }
 0xb98   : > { %3425 = vmatpush3.bf16.msra.mxu1 %v3898_v29 }
 0xb99   : > { %3426 = vmatprep.subr.bf16.mxu1 %v3899_v30 }
 0xb9c   : > { %3427 = vmatpush3.bf16.msra.mxu1 %v3900_v31 }
 0xb9d   : > { %3428 = vmatprep.subr.bf16.mxu1 %v3901_v32 }
 0xba0   : > { %3429 = vmatpush3.bf16.msra.mxu1 %v3902_v33 }
 0xc26   : > { %v2031_v34 = vpop.f32.mrb[28].mxu1 }
 0xc27   : > { %v2037_v35 = vadd.f32 %v2031_v34, %v4447_v43  ;;  %v3676_v36 = vpop.f32.mrb[29].mxu1  ;;  %v400_v43 = vld [vmem:[%s4679_s1 + $0x18] sm:$0xff]  ;;  %v3903_v34 = vld [vmem:[%s4688_s10 + $0x60] sm:$0xff]  }
 0xc28   : > { %v2034_v37 = vpop.f32.mrb[30].mxu1  ;;  %v430_v47 = vadd.f32 %v4189_v61, %v400_v43  ;;  %v3869_v61 = vld [vmem:[%s4685_s7 + $0x30] sm:$0xff]   ;;  %3430 = vmatprep.subr.bf16.mxu1 %v3903_v34  ;;  %v3905_v36 = vld [vmem:[%s4688_s10 + $0x68] sm:$0xff]  }
 0xc29   : > { %v3677_v38 = vpop.f32.mrb[31].mxu1  ;;  %v3906_v37 = vld [vmem:[%s4688_s10 + $0x28] sm:$0xff]   ;;  %v3908_v43 = vld [vmem:[%s4688_s10 + $0x30] sm:$0xff]  }
 0xc2a   : > { %v3907_v38 = vld [vmem:[%s4688_s10 + $0x70] sm:$0xff]  }
 0xc46   : > { %v2137_v39 = vpop.f32.mrb[32].mxu1 }
 0xc47   : > { %v3696_v40 = vpop.f32.mrb[33].mxu1  ;;  %3741 = vmatmul.mubr.msk.f32.vlgmr.msra.gmra.mrb[32].mxu0 %vm743_vm1, %v2137_v39 }
 0xc48   : > { %v2140_v41 = vpop.f32.mrb[34].mxu1  ;;  %3745 = vmatprep.mubr.msk.f32.mxu0 %vm3940_vm0, %v3939_v0 }
 0xc49   : > { %v3697_v42 = vpop.f32.mrb[35].mxu1 }
 0xc66   : > { %v2347_v44 = vpop.f32.mrb[36].mxu1 }
 0xc67   : > { %v3736_v45 = vpop.f32.mrb[37].mxu1  ;;  %3744 = vmatpush3.msra.mxu0 %v2347_v44  ;;  %v3251_v44 = vld [vmem:[%s4686_s8] ss:$0 sm:$0xff] }
 0xc68   : > { %v2350_v46 = vpop.f32.mrb[38].mxu1  ;;  %3748 = vmatprep.subr.bf16.mxu0 %v3939_v0 }
 0xc69   : > { %v3737_v28 = vpop.f32.mrb[39].mxu1 }
 0xd1a   : > { %v2425_v48 = vpop.f32.mrb[32].mxu0 }
 0xd1b   : > { %v2426_v49 = vadd.f32 %v2425_v48, %v430_v47  ;;  %v3742_v50 = vpop.f32.mrb[33].mxu0  ;;  %v3909_v47 = vld [vmem:[%s4688_s10 + $0x78] sm:$0xff]  }
 0xd1c   : > { %v3910_v48 = vld [vmem:[%s4688_s10 + $0x38] sm:$0xff]  }
 0xd1d   : > { %v2429_v52 = vsel %vm820_vm2, %v2426_v49, -inf }
 0xd1e   : > { %2430 = vmax.xlane.f32.xlu1 %v2429_v52 }
 0xdab   : > { %v2431_v53 = vpop.xlane.xlu1 %2430 }
 0xdac   : > { %v2432_v54 = vsub.f32 %v2426_v49, %v2431_v53 }
 0xdae   : > { %v2433_v51 = vmul.f32 1.442695, %v2432_v54 }
 0xdb0   : > { %3925 = vpow2.f32 %v2433_v51 }
 0xdba   : > { %v3926_v55 = vpop.eup %3925 }
 0xdbb   : > { %v2435_v56 = vsel %vm820_vm2, %v3926_v55, 0.0 }
 0xdbc   : > { %2436 = vadd.xlane.f32.xlu0 %v2435_v56 }
 0xe49   : > { %v2437_v57 = vpop.xlane.xlu0 %2436 }
 0xe4a   : > { %3927 = vrcp.f32 %v2437_v57 }
 0xe54   : > { %v3928_v58 = vpop.eup %3927 }
 0xe55   : > { %v2439_v59 = vmul.f32 %v3928_v58, %v3926_v55 }
 0xe57   : > { %3746 = vmatmul.mubr.msk.f32.vlgmr.msra.gmra.mrb[34].mxu0 %vm820_vm2, %v2439_v59 }
 0xe58   : > { %3749 = vmatpush3.bf16.msra.mxu0 %v3869_v61  ;;  %3752 = vmatprep.mubr.msk.bf16.mxu0 %vm3940_vm0, %v3939_v0 }
 0xe59   : > { %3750 = vmatprep.subr.bf16.mxu0 %v3939_v0  ;;  %v3876_v0 = vld [vmem:[%s4687_s9 + $0x14] ss:$8 sps:$4 sm:$0xff]  }
 0xe5c   : > { %3751 = vmatpush3.bf16.msra.mxu0 %v3870_v60 }
 0xe5d   : > { %2688 = vmatprep.subr.bf16.mxu0 %v3873_v3 }
 0xf2a   : > { %v2509_v62 = vpop.f32.mrb[34].mxu0 }
 0xf2b   : > { %v2513_v63 = vpack.c.bf16 %v2509_v62, %v2509_v62  ;;  %v3747_v1 = vpop.f32.mrb[35].mxu0 }
 0xf2d   : > { %3753 = vmatmul.mubr.msk.bf16.vlgmr.msra.gmra.mrb[36].mxu0 %vm743_vm1, %v2513_v63 }
 0xf2e   : > { %2689 = vmatpush1.bf16.msra.mxu0 %v3871_v2  ;;  %2720 = vmatprep.mubr.bf16.mxu0 %v3941_v21 }
 0xf2f   : > { %2690 = vmatprep.subr.bf16.mxu0 %v3876_v0 }
 0xf32   : > { %2691 = vmatpush1.bf16.msra.mxu0 %v3874_v4 }
 0xf33   : > { %2692 = vmatprep.subr.bf16.mxu0 %v3879_v5 }
 0xf36   : > { %2693 = vmatpush1.bf16.msra.mxu0 %v3877_v6 }
 0xf37   : > { %2694 = vmatprep.subr.bf16.mxu0 %v3882_v15 }
 0xf3a   : > { %2695 = vmatpush1.bf16.msra.mxu0 %v3880_v16 }
0x1000   : > { %v2568_v7 = vpop.f32.mrb[36].mxu0 }
0x1001   : > { %v2574_v9 = vadd.f32 %v2568_v7, %v2037_v35  ;;  %v3754_v10 = vpop.f32.mrb[37].mxu0  ;;  %v3904_v35 = vld [vmem:[%s4688_s10 + $0x20] sm:$0xff]  }
0x1002   : > { %v2571_v11 = vpop.f32.mrb[38].mxu0  ;;  %3431 = vmatpush3.bf16.msra.mxu1 %v3904_v35 }
0x1003   : > { %v4583_v12 = vadd.f32 %v2574_v9, %v4040_v8  ;;  %v3755_v13 = vpop.f32.mrb[39].mxu0  ;;  %v3885_v8 = vld [vmem:[%s4687_s9 + $0x44] ss:$8 sps:$4 sm:$0xff]   ;;  %3432 = vmatprep.subr.bf16.mxu1 %v3905_v36 }
0x1004   : > { %2696 = vmatprep.subr.bf16.mxu0 %v3885_v8 }
0x1005   : > { %v2576_v14 = vmul.f32 %v4583_v12, %v4583_v12  ;;  %2697 = vmatpush1.bf16.msra.mxu0 %v3883_v17 }
0x1006   : > { %2698 = vmatprep.subr.bf16.mxu0 %v3888_v18  ;;  %3433 = vmatpush3.bf16.msra.mxu1 %v3906_v37 }
0x1007   : > { %2577 = vadd.xlane.f32.xlu1 %v2576_v14  ;;  %3434 = vmatprep.subr.bf16.mxu1 %v3907_v38 }
0x1009   : > { %2699 = vmatpush1.bf16.msra.mxu0 %v3886_v19 }
0x100a   : > { %2700 = vmatprep.subr.bf16.mxu0 %v3891_v20  ;;  %3435 = vmatpush3.bf16.msra.mxu1 %v3908_v43 }
0x100b   : > { %3436 = vmatprep.subr.bf16.mxu1 %v3909_v47 }
0x100d   : > { %2701 = vmatpush1.bf16.msra.mxu0 %v3889_v22 }
0x100e   : > { %2702 = vmatprep.subr.bf16.mxu0 %v3894_v23  ;;  %3437 = vmatpush3.bf16.msra.mxu1 %v3910_v48 }
0x1011   : > { %2703 = vmatpush1.bf16.msra.mxu0 %v3892_v24 }
0x1094   : > { %v2578_v39 = vpop.xlane.xlu1 %2577 }
0x1095   : > { %v2579_v40 = vmul.f32 0.0078125, %v2578_v39 }
0x1097   : > { %v2580_v41 = vadd.f32 1e-06, %v2579_v40 }
0x1099   : > { %3929 = vrsqrt.f32 %v2580_v41 }
0x10a3   : > { %v3930_v42 = vpop.eup %3929 }
0x10a4   : > { %v2582_v45 = vmul.f32 %v3930_v42, %v4583_v12 }
0x10a6   : > { %v2590_v46 = vmul.f32 %v3251_v44, %v2582_v45 }
0x10a8   : > { %v2591_v28 = vpack.c.bf16 %v2590_v46, %v2590_v46 }
0x10aa   : > { %2721 = vmatmul.mubr.bf16.vlgmr.msra.gmra.mrb[40].mxu0 %v2591_v28 }
0x117d   : > { %v2722_v49 = vpop.f32.mrb[40].mxu0 }
0x117e   : > { %v2729_v50 = vmax.f32 %v2722_v49, 0.0  ;;  %v2724_v52 = vpop.f32.mrb[41].mxu0 }
0x117f   : > { %v2730_v53 = vmax.f32 %v2724_v52, 0.0  ;;  %v2726_v54 = vpop.f32.mrb[42].mxu0 }
0x1180   : > { %v2727_v51 = vpop.f32.mrb[43].mxu0  ;;  %v2731_v56 = vpack.c.bf16 %v2729_v50, %v2729_v50 }
0x1181   : > { %v2732_v55 = vpack.c.bf16 %v2730_v53, %v2730_v53 }
0x1183   : > { %2893 = vmatprep.mubr.bf16.mxu1 %v2732_v55 }
0x1184   : > { %2894 = vmatmul.mubr.bf16.vlgmr.msra.gmra.mrb[40].mxu1 %v2731_v56 }
0x1257   : > { %v3438_v57 = vpop.f32.mrb[40].mxu1 }
0x1258   : > { %v3439_v58 = vpop.f32.mrb[41].mxu1 }
0x1259   : > { %v3440_v61 = vadd.f32 %v3439_v58, %v3438_v57  ;;  %v3441_v59 = vpop.f32.mrb[42].mxu1 }
0x125a   : > { %v3442_v60 = vpop.f32.mrb[43].mxu1 }
0x125b   : > { %v2901_v62 = vadd.f32 %v3440_v61, %v4583_v12 }
0x125d   : > { %v2902_v63 = vpack.c.bf16 %v2901_v62, %v2901_v62 }
0x125f   : > { %2903 = vst [vmem:[%s395_s23] sm:$0xf] %v2902_v63 }
0x1260 PF: > { %s21_s17 = sadd.s32 1, %s3937_s17  }
0x1261   : > { %p18_p4 = scmp.ge.s32.totalorder %s21_s17, 4  }
0x1263   :  { %20 = sbr.rel (!%p18_p4) target bundleno = 1 (0x1), region = 109 }

</bundles_post_ra>
